<compile_context>
chip_gen: v6e
topology: v6e:2x2x1
jax: 0.10.0
libtpu: 0.0.40
codegen_flags: <defaults>
</compile_context>

<pallas_src>
import functools

import numpy as np
import jax
import jax.numpy as jnp
from jax.experimental import pallas as pl
from jax.experimental.pallas import tpu as pltpu


# ----------------------------- static helpers ------------------------------

def _conv_out(n, k, s, p):
    return (n + 2 * p - k) // s + 1


def _round8(n):
    return ((n + 7) // 8) * 8


def _gather_matrix(h_in, w_in, k, stride, pad):
    """0/1 gather matrix for an in-kernel im2col.

    Shape (k*k*gp, h_in*w_in).  For kernel tap t = kh*k + kw, rows
    [t*gp, t*gp + ho*wo) select, for each output position (i, j), the input
    pixel (stride*i + kh - pad, stride*j + kw - pad) of a channels-last
    (h_in*w_in, C) activation slab.  Zero rows encode both the conv zero
    padding and the pad-to-8 row alignment (gp = ho*wo rounded up to 8).
    """
    ho = _conv_out(h_in, k, stride, pad)
    wo = _conv_out(w_in, k, stride, pad)
    m = ho * wo
    gp = _round8(m)
    g = np.zeros((k * k * gp, h_in * w_in), np.float32)
    for kh in range(k):
        for kw in range(k):
            t = kh * k + kw
            for i in range(ho):
                for j in range(wo):
                    r = stride * i + kh - pad
                    c = stride * j + kw - pad
                    if 0 <= r < h_in and 0 <= c < w_in:
                        g[t * gp + i * wo + j, r * w_in + c] = 1.0
    return g, ho, wo, m, gp


def _tap_weights(w):
    """(Cout, Cin, k, k) torch conv weight -> (k*k, Cin, Cout), t = kh*k + kw."""
    cout, cin, k, _ = w.shape
    return jnp.transpose(w, (2, 3, 1, 0)).reshape(k * k, cin, cout)


def im2col(x, k, stride, pad):
    """x:(B,C,H,W) -> (B, Ho*Wo, C*k*k), PyTorch (Cin,kh,kw) column order."""
    B, C, H, W = x.shape
    xp = jnp.pad(x, ((0, 0), (0, 0), (pad, pad), (pad, pad)))
    Ho = _conv_out(H, k, stride, pad)
    Wo = _conv_out(W, k, stride, pad)
    cols = []
    for kh in range(k):
        for kw in range(k):
            cols.append(xp[:, :, kh:kh + stride * Ho:stride,
                           kw:kw + stride * Wo:stride])       # (B,C,Ho,Wo)
    p = jnp.stack(cols, axis=2).reshape(B, C, k, k, Ho, Wo)
    p = p.transpose(0, 4, 5, 1, 2, 3)                         # (B,Ho,Wo,C,k,k)
    return p.reshape(B, Ho * Wo, C * k * k)


# ------------------------------ fused kernel -------------------------------

def _dp1_fused_kernel(p1_ref, w1_ref, b1_ref,
                      g2_ref, w2_ref, b2_ref,
                      g3_ref, w3_ref, b3_ref,
                      wo_ref, bo_ref, out_ref,
                      *, taps, m2, gp2, m3, gp3):
    f32 = jnp.float32
    bf16 = jnp.bfloat16

    # conv1 + ReLU (im2col patches built once outside, from the raw input).
    a1 = jnp.dot(p1_ref[...], w1_ref[...], preferred_element_type=f32)
    a1 = jnp.maximum(a1 + b1_ref[...], 0.0).astype(bf16)          # (M1, 32)

    # conv2 + ReLU: one gather matmul builds all k*k tap slabs, then per-tap
    # (Cin, Cout) matmuls accumulate in f32.  Everything stays in VMEM/vregs.
    p2 = jnp.dot(g2_ref[...], a1, preferred_element_type=f32)     # (taps*gp2, 32)
    acc2 = None
    for t in range(taps):
        pt = p2[t * gp2:(t + 1) * gp2, :].astype(bf16)
        d = jnp.dot(pt, w2_ref[t], preferred_element_type=f32)
        acc2 = d if acc2 is None else acc2 + d
    a2 = jnp.maximum(acc2[:m2, :] + b2_ref[...], 0.0).astype(bf16)  # (m2, 64)

    # conv3 + ReLU (same scheme).
    p3 = jnp.dot(g3_ref[...], a2, preferred_element_type=f32)     # (taps*gp3, 64)
    acc3 = None
    for t in range(taps):
        pt = p3[t * gp3:(t + 1) * gp3, :].astype(bf16)
        d = jnp.dot(pt, w3_ref[t], preferred_element_type=f32)
        acc3 = d if acc3 is None else acc3 + d
    a3 = jnp.maximum(acc3[:m3, :] + b3_ref[...], 0.0)             # (m3, 128) f32

    # AdaptiveAvgPool2d((1,1)) + Linear(128, 2) epilogue.
    pooled = jnp.mean(a3, axis=0, keepdims=True)                  # (1, 128)
    out = jnp.dot(pooled, wo_ref[...], preferred_element_type=f32) + bo_ref[...]
    out_ref[...] = out.astype(out_ref.dtype)                      # (1, 2)


# ------------------------------- wrappers -----------------------------------

def prepare_params(params, H, W):
    """Fold PyTorch-layout weights into kernel-ready (bf16) operands."""
    H1, W1 = _conv_out(H, 8, 4, 2), _conv_out(W, 8, 4, 2)
    g2, _, _, _, _ = _gather_matrix(H1, W1, 4, 2, 1)
    H2, W2 = _conv_out(H1, 4, 2, 1), _conv_out(W1, 4, 2, 1)
    g3, _, _, _, _ = _gather_matrix(H2, W2, 4, 2, 1)
    return {
        "w1": params["w1"].reshape(32, -1).T.astype(jnp.bfloat16),   # (256, 32)
        "b1": params["b1"].reshape(1, -1),
        "g2": jnp.asarray(g2, jnp.bfloat16),
        "w2": _tap_weights(params["w2"]).astype(jnp.bfloat16),       # (16, 32, 64)
        "b2": params["b2"].reshape(1, -1),
        "g3": jnp.asarray(g3, jnp.bfloat16),
        "w3": _tap_weights(params["w3"]).astype(jnp.bfloat16),       # (16, 64, 128)
        "b3": params["b3"].reshape(1, -1),
        "wo": params["wo"],                                          # (128, 2)
        "bo": params["bo"].reshape(1, -1),
    }


@jax.jit
def dp1_forward(kp, x):
    B, Cin, H, W = x.shape
    H1, W1 = _conv_out(H, 8, 4, 2), _conv_out(W, 8, 4, 2)
    H2, W2 = _conv_out(H1, 4, 2, 1), _conv_out(W1, 4, 2, 1)
    H3, W3 = _conv_out(H2, 4, 2, 1), _conv_out(W2, 4, 2, 1)
    M1, m2, m3 = H1 * W1, H2 * W2, H3 * W3
    gp2, gp3 = _round8(m2), _round8(m3)

    patches1 = im2col(x, 8, 4, 2).astype(jnp.bfloat16)         # (B, M1, 256)
    K1 = patches1.shape[-1]

    kernel = functools.partial(
        _dp1_fused_kernel, taps=16, m2=m2, gp2=gp2, m3=m3, gp3=gp3)

    out = pl.pallas_call(
        kernel,
        out_shape=jax.ShapeDtypeStruct((B, 1, 2), jnp.float32),
        grid=(B,),
        in_specs=[
            pl.BlockSpec((None, M1, K1), lambda b: (b, 0, 0)),   # conv1 patches
            pl.BlockSpec(kp["w1"].shape, lambda b: (0, 0)),
            pl.BlockSpec(kp["b1"].shape, lambda b: (0, 0)),
            pl.BlockSpec(kp["g2"].shape, lambda b: (0, 0)),
            pl.BlockSpec(kp["w2"].shape, lambda b: (0, 0, 0)),
            pl.BlockSpec(kp["b2"].shape, lambda b: (0, 0)),
            pl.BlockSpec(kp["g3"].shape, lambda b: (0, 0)),
            pl.BlockSpec(kp["w3"].shape, lambda b: (0, 0, 0)),
            pl.BlockSpec(kp["b3"].shape, lambda b: (0, 0)),
            pl.BlockSpec(kp["wo"].shape, lambda b: (0, 0)),
            pl.BlockSpec(kp["bo"].shape, lambda b: (0, 0)),
        ],
        out_specs=pl.BlockSpec((None, 1, 2), lambda b: (b, 0, 0)),
        compiler_params=pltpu.CompilerParams(
            dimension_semantics=("parallel",)),
    )(patches1, kp["w1"], kp["b1"], kp["g2"], kp["w2"], kp["b2"],
      kp["g3"], kp["w3"], kp["b3"], kp["wo"], kp["bo"])
    return out.reshape(B, 2)


# --------------------------- init & reference -------------------------------

def init_params(key):
    ks = jax.random.split(key, 8)

    def uconv(k, shape):
        fan_in = shape[1] * shape[2] * shape[3]
        bound = 1.0 / jnp.sqrt(fan_in)
        return jax.random.uniform(k, shape, jnp.float32, -bound, bound)

    def ubias(k, n, fan_in):
        bound = 1.0 / jnp.sqrt(fan_in)
        return jax.random.uniform(k, (n,), jnp.float32, -bound, bound)

    return {
        "w1": uconv(ks[0], (32, 4, 8, 8)),   "b1": ubias(ks[1], 32, 4 * 8 * 8),
        "w2": uconv(ks[2], (64, 32, 4, 4)),  "b2": ubias(ks[3], 64, 32 * 4 * 4),
        "w3": uconv(ks[4], (128, 64, 4, 4)), "b3": ubias(ks[5], 128, 64 * 4 * 4),
        # nn.Linear(128, 2): torch weight (2,128); stored transposed (128,2)
        "wo": jax.random.uniform(ks[6], (128, 2), jnp.float32,
                                 -1.0 / jnp.sqrt(128.0), 1.0 / jnp.sqrt(128.0)),
        "bo": jax.random.uniform(ks[7], (2,), jnp.float32,
                                 -1.0 / jnp.sqrt(128.0), 1.0 / jnp.sqrt(128.0)),
    }


def _reference_forward(params, x):
    """Pure-JAX/XLA reference (for a loose correctness check)."""
    def conv(x, w, b, stride, pad):
        y = jax.lax.conv_general_dilated(
            x, w, window_strides=(stride, stride),
            padding=[(pad, pad), (pad, pad)],
            dimension_numbers=("NCHW", "OIHW", "NCHW"))
        return jax.nn.relu(y + b.reshape(1, -1, 1, 1))
    y = conv(x, params["w1"], params["b1"], 4, 2)
    y = conv(y, params["w2"], params["b2"], 2, 1)
    y = conv(y, params["w3"], params["b3"], 2, 1)
    pooled = jnp.mean(y, axis=(2, 3))
    return pooled @ params["wo"] + params["bo"]


if __name__ == "__main__":
    key = jax.random.PRNGKey(0)
    kx, kparam = jax.random.split(key)
    # Input: batch=2, channels=4, spatial 32x32 (NCHW, matching PyTorch conv).
    x = jax.random.normal(kx, (2, 4, 32, 32), dtype=jnp.float32)
    params = init_params(kparam)
    kp = prepare_params(params, 32, 32)

    out = dp1_forward(kp, x)
    jax.block_until_ready(out)
    assert out.shape == (2, 2)

    ref = _reference_forward(params, x)
    np.testing.assert_allclose(np.asarray(out), np.asarray(ref),
                               rtol=5e-2, atol=5e-2)
    print("KERNEL_OK")
</pallas_src>

<mosaic_0001>
module attributes {stable_mosaic.version = 11 : i64} {
  func.func @_dp1_fused_kernel(%arg0: i32, %arg1: memref<1x64x256xbf16, #tpu.memory_space<vmem>>, %arg2: memref<256x32xbf16, #tpu.memory_space<vmem>>, %arg3: memref<1x32xf32, #tpu.memory_space<vmem>>, %arg4: memref<256x64xbf16, #tpu.memory_space<vmem>>, %arg5: memref<16x32x64xbf16, #tpu.memory_space<vmem>>, %arg6: memref<1x64xf32, #tpu.memory_space<vmem>>, %arg7: memref<128x16xbf16, #tpu.memory_space<vmem>>, %arg8: memref<16x64x128xbf16, #tpu.memory_space<vmem>>, %arg9: memref<1x128xf32, #tpu.memory_space<vmem>>, %arg10: memref<128x2xf32, #tpu.memory_space<vmem>>, %arg11: memref<1x2xf32, #tpu.memory_space<vmem>>, %arg12: memref<1x1x2xf32, #tpu.memory_space<vmem>>) attributes {dimension_semantics = [#tpu.dimension_semantics<parallel>], iteration_bounds = array<i64: 2>, scalar_prefetch = 0 : i64, scratch_operands = 0 : i64, tpu.core_type = #tpu.core_type<tc>, window_params = [{transform_indices = @transform_0, window_bounds = array<i64: 1, 64, 256>}, {pipeline_mode = #tpu.pipeline_mode<synchronous>, transform_indices = @transform_1, window_bounds = array<i64: 256, 32>}, {pipeline_mode = #tpu.pipeline_mode<synchronous>, transform_indices = @transform_2, window_bounds = array<i64: 1, 32>}, {pipeline_mode = #tpu.pipeline_mode<synchronous>, transform_indices = @transform_3, window_bounds = array<i64: 256, 64>}, {pipeline_mode = #tpu.pipeline_mode<synchronous>, transform_indices = @transform_4, window_bounds = array<i64: 16, 32, 64>}, {pipeline_mode = #tpu.pipeline_mode<synchronous>, transform_indices = @transform_5, window_bounds = array<i64: 1, 64>}, {pipeline_mode = #tpu.pipeline_mode<synchronous>, transform_indices = @transform_6, window_bounds = array<i64: 128, 16>}, {pipeline_mode = #tpu.pipeline_mode<synchronous>, transform_indices = @transform_7, window_bounds = array<i64: 16, 64, 128>}, {pipeline_mode = #tpu.pipeline_mode<synchronous>, transform_indices = @transform_8, window_bounds = array<i64: 1, 128>}, {pipeline_mode = #tpu.pipeline_mode<synchronous>, transform_indices = @transform_9, window_bounds = array<i64: 128, 2>}, {pipeline_mode = #tpu.pipeline_mode<synchronous>, transform_indices = @transform_10, window_bounds = array<i64: 1, 2>}, {transform_indices = @transform_11, window_bounds = array<i64: 1, 1, 2>}]} {
    %c0 = arith.constant 0 : index
    %c0_0 = arith.constant 0 : index
    %c0_1 = arith.constant 0 : index
    %0 = vector.load %arg1[%c0, %c0_0, %c0_1] : memref<1x64x256xbf16, #tpu.memory_space<vmem>>, vector<1x64x256xbf16>
    %1 = vector.shape_cast %0 : vector<1x64x256xbf16> to vector<64x256xbf16>
    %c0_2 = arith.constant 0 : index
    %c0_3 = arith.constant 0 : index
    %2 = vector.load %arg2[%c0_2, %c0_3] : memref<256x32xbf16, #tpu.memory_space<vmem>>, vector<256x32xbf16>
    %cst = arith.constant dense<0.000000e+00> : vector<64x32xf32>
    %3 = tpu.matmul %1, %2, %cst {dimension_numbers = #tpu.dot_dimension_numbers<[1], [0], [0], [1], [0, 0, 1, 1], [], []>} : vector<64x256xbf16>, vector<256x32xbf16>, vector<64x32xf32> -> vector<64x32xf32>
    %c0_4 = arith.constant 0 : index
    %c0_5 = arith.constant 0 : index
    %4 = vector.load %arg3[%c0_4, %c0_5] : memref<1x32xf32, #tpu.memory_space<vmem>>, vector<1x32xf32>
    %5 = vector.broadcast %4 : vector<1x32xf32> to vector<64x32xf32>
    %6 = arith.addf %3, %5 : vector<64x32xf32>
    %cst_6 = arith.constant 0.000000e+00 : f32
    %7 = vector.broadcast %cst_6 : f32 to vector<64x32xf32>
    %8 = arith.maximumf %6, %7 : vector<64x32xf32>
    %9 = arith.truncf %8 : vector<64x32xf32> to vector<64x32xbf16>
    %c0_7 = arith.constant 0 : index
    %c0_8 = arith.constant 0 : index
    %10 = vector.load %arg4[%c0_7, %c0_8] : memref<256x64xbf16, #tpu.memory_space<vmem>>, vector<256x64xbf16>
    %cst_9 = arith.constant dense<0.000000e+00> : vector<256x32xf32>
    %11 = tpu.matmul %10, %9, %cst_9 {dimension_numbers = #tpu.dot_dimension_numbers<[1], [0], [0], [1], [0, 0, 1, 1], [], []>} : vector<256x64xbf16>, vector<64x32xbf16>, vector<256x32xf32> -> vector<256x32xf32>
    %12 = vector.extract_strided_slice %11 {offsets = [0, 0], sizes = [16, 32], strides = [1, 1]} : vector<256x32xf32> to vector<16x32xf32>
    %13 = arith.truncf %12 : vector<16x32xf32> to vector<16x32xbf16>
    %c0_10 = arith.constant 0 : index
    %c0_11 = arith.constant 0 : index
    %c0_12 = arith.constant 0 : index
    %14 = vector.load %arg5[%c0_10, %c0_11, %c0_12] : memref<16x32x64xbf16, #tpu.memory_space<vmem>>, vector<1x32x64xbf16>
    %15 = vector.shape_cast %14 : vector<1x32x64xbf16> to vector<32x64xbf16>
    %cst_13 = arith.constant dense<0.000000e+00> : vector<16x64xf32>
    %16 = tpu.matmul %13, %15, %cst_13 {dimension_numbers = #tpu.dot_dimension_numbers<[1], [0], [0], [1], [0, 0, 1, 1], [], []>} : vector<16x32xbf16>, vector<32x64xbf16>, vector<16x64xf32> -> vector<16x64xf32>
    %17 = vector.extract_strided_slice %11 {offsets = [16, 0], sizes = [16, 32], strides = [1, 1]} : vector<256x32xf32> to vector<16x32xf32>
    %18 = arith.truncf %17 : vector<16x32xf32> to vector<16x32xbf16>
    %c1 = arith.constant 1 : index
    %c0_14 = arith.constant 0 : index
    %c0_15 = arith.constant 0 : index
    %19 = vector.load %arg5[%c1, %c0_14, %c0_15] : memref<16x32x64xbf16, #tpu.memory_space<vmem>>, vector<1x32x64xbf16>
    %20 = vector.shape_cast %19 : vector<1x32x64xbf16> to vector<32x64xbf16>
    %cst_16 = arith.constant dense<0.000000e+00> : vector<16x64xf32>
    %21 = tpu.matmul %18, %20, %cst_16 {dimension_numbers = #tpu.dot_dimension_numbers<[1], [0], [0], [1], [0, 0, 1, 1], [], []>} : vector<16x32xbf16>, vector<32x64xbf16>, vector<16x64xf32> -> vector<16x64xf32>
    %22 = arith.addf %16, %21 : vector<16x64xf32>
    %23 = vector.extract_strided_slice %11 {offsets = [32, 0], sizes = [16, 32], strides = [1, 1]} : vector<256x32xf32> to vector<16x32xf32>
    %24 = arith.truncf %23 : vector<16x32xf32> to vector<16x32xbf16>
    %c2 = arith.constant 2 : index
    %c0_17 = arith.constant 0 : index
    %c0_18 = arith.constant 0 : index
    %25 = vector.load %arg5[%c2, %c0_17, %c0_18] : memref<16x32x64xbf16, #tpu.memory_space<vmem>>, vector<1x32x64xbf16>
    %26 = vector.shape_cast %25 : vector<1x32x64xbf16> to vector<32x64xbf16>
    %cst_19 = arith.constant dense<0.000000e+00> : vector<16x64xf32>
    %27 = tpu.matmul %24, %26, %cst_19 {dimension_numbers = #tpu.dot_dimension_numbers<[1], [0], [0], [1], [0, 0, 1, 1], [], []>} : vector<16x32xbf16>, vector<32x64xbf16>, vector<16x64xf32> -> vector<16x64xf32>
    %28 = arith.addf %22, %27 : vector<16x64xf32>
    %29 = vector.extract_strided_slice %11 {offsets = [48, 0], sizes = [16, 32], strides = [1, 1]} : vector<256x32xf32> to vector<16x32xf32>
    %30 = arith.truncf %29 : vector<16x32xf32> to vector<16x32xbf16>
    %c3 = arith.constant 3 : index
    %c0_20 = arith.constant 0 : index
    %c0_21 = arith.constant 0 : index
    %31 = vector.load %arg5[%c3, %c0_20, %c0_21] : memref<16x32x64xbf16, #tpu.memory_space<vmem>>, vector<1x32x64xbf16>
    %32 = vector.shape_cast %31 : vector<1x32x64xbf16> to vector<32x64xbf16>
    %cst_22 = arith.constant dense<0.000000e+00> : vector<16x64xf32>
    %33 = tpu.matmul %30, %32, %cst_22 {dimension_numbers = #tpu.dot_dimension_numbers<[1], [0], [0], [1], [0, 0, 1, 1], [], []>} : vector<16x32xbf16>, vector<32x64xbf16>, vector<16x64xf32> -> vector<16x64xf32>
    %34 = arith.addf %28, %33 : vector<16x64xf32>
    %35 = vector.extract_strided_slice %11 {offsets = [64, 0], sizes = [16, 32], strides = [1, 1]} : vector<256x32xf32> to vector<16x32xf32>
    %36 = arith.truncf %35 : vector<16x32xf32> to vector<16x32xbf16>
    %c4 = arith.constant 4 : index
    %c0_23 = arith.constant 0 : index
    %c0_24 = arith.constant 0 : index
    %37 = vector.load %arg5[%c4, %c0_23, %c0_24] : memref<16x32x64xbf16, #tpu.memory_space<vmem>>, vector<1x32x64xbf16>
    %38 = vector.shape_cast %37 : vector<1x32x64xbf16> to vector<32x64xbf16>
    %cst_25 = arith.constant dense<0.000000e+00> : vector<16x64xf32>
    %39 = tpu.matmul %36, %38, %cst_25 {dimension_numbers = #tpu.dot_dimension_numbers<[1], [0], [0], [1], [0, 0, 1, 1], [], []>} : vector<16x32xbf16>, vector<32x64xbf16>, vector<16x64xf32> -> vector<16x64xf32>
    %40 = arith.addf %34, %39 : vector<16x64xf32>
    %41 = vector.extract_strided_slice %11 {offsets = [80, 0], sizes = [16, 32], strides = [1, 1]} : vector<256x32xf32> to vector<16x32xf32>
    %42 = arith.truncf %41 : vector<16x32xf32> to vector<16x32xbf16>
    %c5 = arith.constant 5 : index
    %c0_26 = arith.constant 0 : index
    %c0_27 = arith.constant 0 : index
    %43 = vector.load %arg5[%c5, %c0_26, %c0_27] : memref<16x32x64xbf16, #tpu.memory_space<vmem>>, vector<1x32x64xbf16>
    %44 = vector.shape_cast %43 : vector<1x32x64xbf16> to vector<32x64xbf16>
    %cst_28 = arith.constant dense<0.000000e+00> : vector<16x64xf32>
    %45 = tpu.matmul %42, %44, %cst_28 {dimension_numbers = #tpu.dot_dimension_numbers<[1], [0], [0], [1], [0, 0, 1, 1], [], []>} : vector<16x32xbf16>, vector<32x64xbf16>, vector<16x64xf32> -> vector<16x64xf32>
    %46 = arith.addf %40, %45 : vector<16x64xf32>
    %47 = vector.extract_strided_slice %11 {offsets = [96, 0], sizes = [16, 32], strides = [1, 1]} : vector<256x32xf32> to vector<16x32xf32>
    %48 = arith.truncf %47 : vector<16x32xf32> to vector<16x32xbf16>
    %c6 = arith.constant 6 : index
    %c0_29 = arith.constant 0 : index
    %c0_30 = arith.constant 0 : index
    %49 = vector.load %arg5[%c6, %c0_29, %c0_30] : memref<16x32x64xbf16, #tpu.memory_space<vmem>>, vector<1x32x64xbf16>
    %50 = vector.shape_cast %49 : vector<1x32x64xbf16> to vector<32x64xbf16>
    %cst_31 = arith.constant dense<0.000000e+00> : vector<16x64xf32>
    %51 = tpu.matmul %48, %50, %cst_31 {dimension_numbers = #tpu.dot_dimension_numbers<[1], [0], [0], [1], [0, 0, 1, 1], [], []>} : vector<16x32xbf16>, vector<32x64xbf16>, vector<16x64xf32> -> vector<16x64xf32>
    %52 = arith.addf %46, %51 : vector<16x64xf32>
    %53 = vector.extract_strided_slice %11 {offsets = [112, 0], sizes = [16, 32], strides = [1, 1]} : vector<256x32xf32> to vector<16x32xf32>
    %54 = arith.truncf %53 : vector<16x32xf32> to vector<16x32xbf16>
    %c7 = arith.constant 7 : index
    %c0_32 = arith.constant 0 : index
    %c0_33 = arith.constant 0 : index
    %55 = vector.load %arg5[%c7, %c0_32, %c0_33] : memref<16x32x64xbf16, #tpu.memory_space<vmem>>, vector<1x32x64xbf16>
    %56 = vector.shape_cast %55 : vector<1x32x64xbf16> to vector<32x64xbf16>
    %cst_34 = arith.constant dense<0.000000e+00> : vector<16x64xf32>
    %57 = tpu.matmul %54, %56, %cst_34 {dimension_numbers = #tpu.dot_dimension_numbers<[1], [0], [0], [1], [0, 0, 1, 1], [], []>} : vector<16x32xbf16>, vector<32x64xbf16>, vector<16x64xf32> -> vector<16x64xf32>
    %58 = arith.addf %52, %57 : vector<16x64xf32>
    %59 = vector.extract_strided_slice %11 {offsets = [128, 0], sizes = [16, 32], strides = [1, 1]} : vector<256x32xf32> to vector<16x32xf32>
    %60 = arith.truncf %59 : vector<16x32xf32> to vector<16x32xbf16>
    %c8 = arith.constant 8 : index
    %c0_35 = arith.constant 0 : index
    %c0_36 = arith.constant 0 : index
    %61 = vector.load %arg5[%c8, %c0_35, %c0_36] : memref<16x32x64xbf16, #tpu.memory_space<vmem>>, vector<1x32x64xbf16>
    %62 = vector.shape_cast %61 : vector<1x32x64xbf16> to vector<32x64xbf16>
    %cst_37 = arith.constant dense<0.000000e+00> : vector<16x64xf32>
    %63 = tpu.matmul %60, %62, %cst_37 {dimension_numbers = #tpu.dot_dimension_numbers<[1], [0], [0], [1], [0, 0, 1, 1], [], []>} : vector<16x32xbf16>, vector<32x64xbf16>, vector<16x64xf32> -> vector<16x64xf32>
    %64 = arith.addf %58, %63 : vector<16x64xf32>
    %65 = vector.extract_strided_slice %11 {offsets = [144, 0], sizes = [16, 32], strides = [1, 1]} : vector<256x32xf32> to vector<16x32xf32>
    %66 = arith.truncf %65 : vector<16x32xf32> to vector<16x32xbf16>
    %c9 = arith.constant 9 : index
    %c0_38 = arith.constant 0 : index
    %c0_39 = arith.constant 0 : index
    %67 = vector.load %arg5[%c9, %c0_38, %c0_39] : memref<16x32x64xbf16, #tpu.memory_space<vmem>>, vector<1x32x64xbf16>
    %68 = vector.shape_cast %67 : vector<1x32x64xbf16> to vector<32x64xbf16>
    %cst_40 = arith.constant dense<0.000000e+00> : vector<16x64xf32>
    %69 = tpu.matmul %66, %68, %cst_40 {dimension_numbers = #tpu.dot_dimension_numbers<[1], [0], [0], [1], [0, 0, 1, 1], [], []>} : vector<16x32xbf16>, vector<32x64xbf16>, vector<16x64xf32> -> vector<16x64xf32>
    %70 = arith.addf %64, %69 : vector<16x64xf32>
    %71 = vector.extract_strided_slice %11 {offsets = [160, 0], sizes = [16, 32], strides = [1, 1]} : vector<256x32xf32> to vector<16x32xf32>
    %72 = arith.truncf %71 : vector<16x32xf32> to vector<16x32xbf16>
    %c10 = arith.constant 10 : index
    %c0_41 = arith.constant 0 : index
    %c0_42 = arith.constant 0 : index
    %73 = vector.load %arg5[%c10, %c0_41, %c0_42] : memref<16x32x64xbf16, #tpu.memory_space<vmem>>, vector<1x32x64xbf16>
    %74 = vector.shape_cast %73 : vector<1x32x64xbf16> to vector<32x64xbf16>
    %cst_43 = arith.constant dense<0.000000e+00> : vector<16x64xf32>
    %75 = tpu.matmul %72, %74, %cst_43 {dimension_numbers = #tpu.dot_dimension_numbers<[1], [0], [0], [1], [0, 0, 1, 1], [], []>} : vector<16x32xbf16>, vector<32x64xbf16>, vector<16x64xf32> -> vector<16x64xf32>
    %76 = arith.addf %70, %75 : vector<16x64xf32>
    %77 = vector.extract_strided_slice %11 {offsets = [176, 0], sizes = [16, 32], strides = [1, 1]} : vector<256x32xf32> to vector<16x32xf32>
    %78 = arith.truncf %77 : vector<16x32xf32> to vector<16x32xbf16>
    %c11 = arith.constant 11 : index
    %c0_44 = arith.constant 0 : index
    %c0_45 = arith.constant 0 : index
    %79 = vector.load %arg5[%c11, %c0_44, %c0_45] : memref<16x32x64xbf16, #tpu.memory_space<vmem>>, vector<1x32x64xbf16>
    %80 = vector.shape_cast %79 : vector<1x32x64xbf16> to vector<32x64xbf16>
    %cst_46 = arith.constant dense<0.000000e+00> : vector<16x64xf32>
    %81 = tpu.matmul %78, %80, %cst_46 {dimension_numbers = #tpu.dot_dimension_numbers<[1], [0], [0], [1], [0, 0, 1, 1], [], []>} : vector<16x32xbf16>, vector<32x64xbf16>, vector<16x64xf32> -> vector<16x64xf32>
    %82 = arith.addf %76, %81 : vector<16x64xf32>
    %83 = vector.extract_strided_slice %11 {offsets = [192, 0], sizes = [16, 32], strides = [1, 1]} : vector<256x32xf32> to vector<16x32xf32>
    %84 = arith.truncf %83 : vector<16x32xf32> to vector<16x32xbf16>
    %c12 = arith.constant 12 : index
    %c0_47 = arith.constant 0 : index
    %c0_48 = arith.constant 0 : index
    %85 = vector.load %arg5[%c12, %c0_47, %c0_48] : memref<16x32x64xbf16, #tpu.memory_space<vmem>>, vector<1x32x64xbf16>
    %86 = vector.shape_cast %85 : vector<1x32x64xbf16> to vector<32x64xbf16>
    %cst_49 = arith.constant dense<0.000000e+00> : vector<16x64xf32>
    %87 = tpu.matmul %84, %86, %cst_49 {dimension_numbers = #tpu.dot_dimension_numbers<[1], [0], [0], [1], [0, 0, 1, 1], [], []>} : vector<16x32xbf16>, vector<32x64xbf16>, vector<16x64xf32> -> vector<16x64xf32>
    %88 = arith.addf %82, %87 : vector<16x64xf32>
    %89 = vector.extract_strided_slice %11 {offsets = [208, 0], sizes = [16, 32], strides = [1, 1]} : vector<256x32xf32> to vector<16x32xf32>
    %90 = arith.truncf %89 : vector<16x32xf32> to vector<16x32xbf16>
    %c13 = arith.constant 13 : index
    %c0_50 = arith.constant 0 : index
    %c0_51 = arith.constant 0 : index
    %91 = vector.load %arg5[%c13, %c0_50, %c0_51] : memref<16x32x64xbf16, #tpu.memory_space<vmem>>, vector<1x32x64xbf16>
    %92 = vector.shape_cast %91 : vector<1x32x64xbf16> to vector<32x64xbf16>
    %cst_52 = arith.constant dense<0.000000e+00> : vector<16x64xf32>
    %93 = tpu.matmul %90, %92, %cst_52 {dimension_numbers = #tpu.dot_dimension_numbers<[1], [0], [0], [1], [0, 0, 1, 1], [], []>} : vector<16x32xbf16>, vector<32x64xbf16>, vector<16x64xf32> -> vector<16x64xf32>
    %94 = arith.addf %88, %93 : vector<16x64xf32>
    %95 = vector.extract_strided_slice %11 {offsets = [224, 0], sizes = [16, 32], strides = [1, 1]} : vector<256x32xf32> to vector<16x32xf32>
    %96 = arith.truncf %95 : vector<16x32xf32> to vector<16x32xbf16>
    %c14 = arith.constant 14 : index
    %c0_53 = arith.constant 0 : index
    %c0_54 = arith.constant 0 : index
    %97 = vector.load %arg5[%c14, %c0_53, %c0_54] : memref<16x32x64xbf16, #tpu.memory_space<vmem>>, vector<1x32x64xbf16>
    %98 = vector.shape_cast %97 : vector<1x32x64xbf16> to vector<32x64xbf16>
    %cst_55 = arith.constant dense<0.000000e+00> : vector<16x64xf32>
    %99 = tpu.matmul %96, %98, %cst_55 {dimension_numbers = #tpu.dot_dimension_numbers<[1], [0], [0], [1], [0, 0, 1, 1], [], []>} : vector<16x32xbf16>, vector<32x64xbf16>, vector<16x64xf32> -> vector<16x64xf32>
    %100 = arith.addf %94, %99 : vector<16x64xf32>
    %101 = vector.extract_strided_slice %11 {offsets = [240, 0], sizes = [16, 32], strides = [1, 1]} : vector<256x32xf32> to vector<16x32xf32>
    %102 = arith.truncf %101 : vector<16x32xf32> to vector<16x32xbf16>
    %c15 = arith.constant 15 : index
    %c0_56 = arith.constant 0 : index
    %c0_57 = arith.constant 0 : index
    %103 = vector.load %arg5[%c15, %c0_56, %c0_57] : memref<16x32x64xbf16, #tpu.memory_space<vmem>>, vector<1x32x64xbf16>
    %104 = vector.shape_cast %103 : vector<1x32x64xbf16> to vector<32x64xbf16>
    %cst_58 = arith.constant dense<0.000000e+00> : vector<16x64xf32>
    %105 = tpu.matmul %102, %104, %cst_58 {dimension_numbers = #tpu.dot_dimension_numbers<[1], [0], [0], [1], [0, 0, 1, 1], [], []>} : vector<16x32xbf16>, vector<32x64xbf16>, vector<16x64xf32> -> vector<16x64xf32>
    %106 = arith.addf %100, %105 : vector<16x64xf32>
    %c0_59 = arith.constant 0 : index
    %c0_60 = arith.constant 0 : index
    %107 = vector.load %arg6[%c0_59, %c0_60] : memref<1x64xf32, #tpu.memory_space<vmem>>, vector<1x64xf32>
    %108 = vector.broadcast %107 : vector<1x64xf32> to vector<16x64xf32>
    %109 = arith.addf %106, %108 : vector<16x64xf32>
    %cst_61 = arith.constant 0.000000e+00 : f32
    %110 = vector.broadcast %cst_61 : f32 to vector<16x64xf32>
    %111 = arith.maximumf %109, %110 : vector<16x64xf32>
    %112 = arith.truncf %111 : vector<16x64xf32> to vector<16x64xbf16>
    %c0_62 = arith.constant 0 : index
    %c0_63 = arith.constant 0 : index
    %113 = vector.load %arg7[%c0_62, %c0_63] : memref<128x16xbf16, #tpu.memory_space<vmem>>, vector<128x16xbf16>
    %cst_64 = arith.constant dense<0.000000e+00> : vector<128x64xf32>
    %114 = tpu.matmul %113, %112, %cst_64 {dimension_numbers = #tpu.dot_dimension_numbers<[1], [0], [0], [1], [0, 0, 1, 1], [], []>} : vector<128x16xbf16>, vector<16x64xbf16>, vector<128x64xf32> -> vector<128x64xf32>
    %115 = vector.extract_strided_slice %114 {offsets = [0, 0], sizes = [8, 64], strides = [1, 1]} : vector<128x64xf32> to vector<8x64xf32>
    %116 = arith.truncf %115 : vector<8x64xf32> to vector<8x64xbf16>
    %c0_65 = arith.constant 0 : index
    %c0_66 = arith.constant 0 : index
    %c0_67 = arith.constant 0 : index
    %117 = vector.load %arg8[%c0_65, %c0_66, %c0_67] : memref<16x64x128xbf16, #tpu.memory_space<vmem>>, vector<1x64x128xbf16>
    %118 = vector.shape_cast %117 : vector<1x64x128xbf16> to vector<64x128xbf16>
    %cst_68 = arith.constant dense<0.000000e+00> : vector<8x128xf32>
    %119 = tpu.matmul %116, %118, %cst_68 {dimension_numbers = #tpu.dot_dimension_numbers<[1], [0], [0], [1], [0, 0, 1, 1], [], []>} : vector<8x64xbf16>, vector<64x128xbf16>, vector<8x128xf32> -> vector<8x128xf32>
    %120 = vector.extract_strided_slice %114 {offsets = [8, 0], sizes = [8, 64], strides = [1, 1]} : vector<128x64xf32> to vector<8x64xf32>
    %121 = arith.truncf %120 : vector<8x64xf32> to vector<8x64xbf16>
    %c1_69 = arith.constant 1 : index
    %c0_70 = arith.constant 0 : index
    %c0_71 = arith.constant 0 : index
    %122 = vector.load %arg8[%c1_69, %c0_70, %c0_71] : memref<16x64x128xbf16, #tpu.memory_space<vmem>>, vector<1x64x128xbf16>
    %123 = vector.shape_cast %122 : vector<1x64x128xbf16> to vector<64x128xbf16>
    %cst_72 = arith.constant dense<0.000000e+00> : vector<8x128xf32>
    %124 = tpu.matmul %121, %123, %cst_72 {dimension_numbers = #tpu.dot_dimension_numbers<[1], [0], [0], [1], [0, 0, 1, 1], [], []>} : vector<8x64xbf16>, vector<64x128xbf16>, vector<8x128xf32> -> vector<8x128xf32>
    %125 = arith.addf %119, %124 : vector<8x128xf32>
    %126 = vector.extract_strided_slice %114 {offsets = [16, 0], sizes = [8, 64], strides = [1, 1]} : vector<128x64xf32> to vector<8x64xf32>
    %127 = arith.truncf %126 : vector<8x64xf32> to vector<8x64xbf16>
    %c2_73 = arith.constant 2 : index
    %c0_74 = arith.constant 0 : index
    %c0_75 = arith.constant 0 : index
    %128 = vector.load %arg8[%c2_73, %c0_74, %c0_75] : memref<16x64x128xbf16, #tpu.memory_space<vmem>>, vector<1x64x128xbf16>
    %129 = vector.shape_cast %128 : vector<1x64x128xbf16> to vector<64x128xbf16>
    %cst_76 = arith.constant dense<0.000000e+00> : vector<8x128xf32>
    %130 = tpu.matmul %127, %129, %cst_76 {dimension_numbers = #tpu.dot_dimension_numbers<[1], [0], [0], [1], [0, 0, 1, 1], [], []>} : vector<8x64xbf16>, vector<64x128xbf16>, vector<8x128xf32> -> vector<8x128xf32>
    %131 = arith.addf %125, %130 : vector<8x128xf32>
    %132 = vector.extract_strided_slice %114 {offsets = [24, 0], sizes = [8, 64], strides = [1, 1]} : vector<128x64xf32> to vector<8x64xf32>
    %133 = arith.truncf %132 : vector<8x64xf32> to vector<8x64xbf16>
    %c3_77 = arith.constant 3 : index
    %c0_78 = arith.constant 0 : index
    %c0_79 = arith.constant 0 : index
    %134 = vector.load %arg8[%c3_77, %c0_78, %c0_79] : memref<16x64x128xbf16, #tpu.memory_space<vmem>>, vector<1x64x128xbf16>
    %135 = vector.shape_cast %134 : vector<1x64x128xbf16> to vector<64x128xbf16>
    %cst_80 = arith.constant dense<0.000000e+00> : vector<8x128xf32>
    %136 = tpu.matmul %133, %135, %cst_80 {dimension_numbers = #tpu.dot_dimension_numbers<[1], [0], [0], [1], [0, 0, 1, 1], [], []>} : vector<8x64xbf16>, vector<64x128xbf16>, vector<8x128xf32> -> vector<8x128xf32>
    %137 = arith.addf %131, %136 : vector<8x128xf32>
    %138 = vector.extract_strided_slice %114 {offsets = [32, 0], sizes = [8, 64], strides = [1, 1]} : vector<128x64xf32> to vector<8x64xf32>
    %139 = arith.truncf %138 : vector<8x64xf32> to vector<8x64xbf16>
    %c4_81 = arith.constant 4 : index
    %c0_82 = arith.constant 0 : index
    %c0_83 = arith.constant 0 : index
    %140 = vector.load %arg8[%c4_81, %c0_82, %c0_83] : memref<16x64x128xbf16, #tpu.memory_space<vmem>>, vector<1x64x128xbf16>
    %141 = vector.shape_cast %140 : vector<1x64x128xbf16> to vector<64x128xbf16>
    %cst_84 = arith.constant dense<0.000000e+00> : vector<8x128xf32>
    %142 = tpu.matmul %139, %141, %cst_84 {dimension_numbers = #tpu.dot_dimension_numbers<[1], [0], [0], [1], [0, 0, 1, 1], [], []>} : vector<8x64xbf16>, vector<64x128xbf16>, vector<8x128xf32> -> vector<8x128xf32>
    %143 = arith.addf %137, %142 : vector<8x128xf32>
    %144 = vector.extract_strided_slice %114 {offsets = [40, 0], sizes = [8, 64], strides = [1, 1]} : vector<128x64xf32> to vector<8x64xf32>
    %145 = arith.truncf %144 : vector<8x64xf32> to vector<8x64xbf16>
    %c5_85 = arith.constant 5 : index
    %c0_86 = arith.constant 0 : index
    %c0_87 = arith.constant 0 : index
    %146 = vector.load %arg8[%c5_85, %c0_86, %c0_87] : memref<16x64x128xbf16, #tpu.memory_space<vmem>>, vector<1x64x128xbf16>
    %147 = vector.shape_cast %146 : vector<1x64x128xbf16> to vector<64x128xbf16>
    %cst_88 = arith.constant dense<0.000000e+00> : vector<8x128xf32>
    %148 = tpu.matmul %145, %147, %cst_88 {dimension_numbers = #tpu.dot_dimension_numbers<[1], [0], [0], [1], [0, 0, 1, 1], [], []>} : vector<8x64xbf16>, vector<64x128xbf16>, vector<8x128xf32> -> vector<8x128xf32>
    %149 = arith.addf %143, %148 : vector<8x128xf32>
    %150 = vector.extract_strided_slice %114 {offsets = [48, 0], sizes = [8, 64], strides = [1, 1]} : vector<128x64xf32> to vector<8x64xf32>
    %151 = arith.truncf %150 : vector<8x64xf32> to vector<8x64xbf16>
    %c6_89 = arith.constant 6 : index
    %c0_90 = arith.constant 0 : index
    %c0_91 = arith.constant 0 : index
    %152 = vector.load %arg8[%c6_89, %c0_90, %c0_91] : memref<16x64x128xbf16, #tpu.memory_space<vmem>>, vector<1x64x128xbf16>
    %153 = vector.shape_cast %152 : vector<1x64x128xbf16> to vector<64x128xbf16>
    %cst_92 = arith.constant dense<0.000000e+00> : vector<8x128xf32>
    %154 = tpu.matmul %151, %153, %cst_92 {dimension_numbers = #tpu.dot_dimension_numbers<[1], [0], [0], [1], [0, 0, 1, 1], [], []>} : vector<8x64xbf16>, vector<64x128xbf16>, vector<8x128xf32> -> vector<8x128xf32>
    %155 = arith.addf %149, %154 : vector<8x128xf32>
    %156 = vector.extract_strided_slice %114 {offsets = [56, 0], sizes = [8, 64], strides = [1, 1]} : vector<128x64xf32> to vector<8x64xf32>
    %157 = arith.truncf %156 : vector<8x64xf32> to vector<8x64xbf16>
    %c7_93 = arith.constant 7 : index
    %c0_94 = arith.constant 0 : index
    %c0_95 = arith.constant 0 : index
    %158 = vector.load %arg8[%c7_93, %c0_94, %c0_95] : memref<16x64x128xbf16, #tpu.memory_space<vmem>>, vector<1x64x128xbf16>
    %159 = vector.shape_cast %158 : vector<1x64x128xbf16> to vector<64x128xbf16>
    %cst_96 = arith.constant dense<0.000000e+00> : vector<8x128xf32>
    %160 = tpu.matmul %157, %159, %cst_96 {dimension_numbers = #tpu.dot_dimension_numbers<[1], [0], [0], [1], [0, 0, 1, 1], [], []>} : vector<8x64xbf16>, vector<64x128xbf16>, vector<8x128xf32> -> vector<8x128xf32>
    %161 = arith.addf %155, %160 : vector<8x128xf32>
    %162 = vector.extract_strided_slice %114 {offsets = [64, 0], sizes = [8, 64], strides = [1, 1]} : vector<128x64xf32> to vector<8x64xf32>
    %163 = arith.truncf %162 : vector<8x64xf32> to vector<8x64xbf16>
    %c8_97 = arith.constant 8 : index
    %c0_98 = arith.constant 0 : index
    %c0_99 = arith.constant 0 : index
    %164 = vector.load %arg8[%c8_97, %c0_98, %c0_99] : memref<16x64x128xbf16, #tpu.memory_space<vmem>>, vector<1x64x128xbf16>
    %165 = vector.shape_cast %164 : vector<1x64x128xbf16> to vector<64x128xbf16>
    %cst_100 = arith.constant dense<0.000000e+00> : vector<8x128xf32>
    %166 = tpu.matmul %163, %165, %cst_100 {dimension_numbers = #tpu.dot_dimension_numbers<[1], [0], [0], [1], [0, 0, 1, 1], [], []>} : vector<8x64xbf16>, vector<64x128xbf16>, vector<8x128xf32> -> vector<8x128xf32>
    %167 = arith.addf %161, %166 : vector<8x128xf32>
    %168 = vector.extract_strided_slice %114 {offsets = [72, 0], sizes = [8, 64], strides = [1, 1]} : vector<128x64xf32> to vector<8x64xf32>
    %169 = arith.truncf %168 : vector<8x64xf32> to vector<8x64xbf16>
    %c9_101 = arith.constant 9 : index
    %c0_102 = arith.constant 0 : index
    %c0_103 = arith.constant 0 : index
    %170 = vector.load %arg8[%c9_101, %c0_102, %c0_103] : memref<16x64x128xbf16, #tpu.memory_space<vmem>>, vector<1x64x128xbf16>
    %171 = vector.shape_cast %170 : vector<1x64x128xbf16> to vector<64x128xbf16>
    %cst_104 = arith.constant dense<0.000000e+00> : vector<8x128xf32>
    %172 = tpu.matmul %169, %171, %cst_104 {dimension_numbers = #tpu.dot_dimension_numbers<[1], [0], [0], [1], [0, 0, 1, 1], [], []>} : vector<8x64xbf16>, vector<64x128xbf16>, vector<8x128xf32> -> vector<8x128xf32>
    %173 = arith.addf %167, %172 : vector<8x128xf32>
    %174 = vector.extract_strided_slice %114 {offsets = [80, 0], sizes = [8, 64], strides = [1, 1]} : vector<128x64xf32> to vector<8x64xf32>
    %175 = arith.truncf %174 : vector<8x64xf32> to vector<8x64xbf16>
    %c10_105 = arith.constant 10 : index
    %c0_106 = arith.constant 0 : index
    %c0_107 = arith.constant 0 : index
    %176 = vector.load %arg8[%c10_105, %c0_106, %c0_107] : memref<16x64x128xbf16, #tpu.memory_space<vmem>>, vector<1x64x128xbf16>
    %177 = vector.shape_cast %176 : vector<1x64x128xbf16> to vector<64x128xbf16>
    %cst_108 = arith.constant dense<0.000000e+00> : vector<8x128xf32>
    %178 = tpu.matmul %175, %177, %cst_108 {dimension_numbers = #tpu.dot_dimension_numbers<[1], [0], [0], [1], [0, 0, 1, 1], [], []>} : vector<8x64xbf16>, vector<64x128xbf16>, vector<8x128xf32> -> vector<8x128xf32>
    %179 = arith.addf %173, %178 : vector<8x128xf32>
    %180 = vector.extract_strided_slice %114 {offsets = [88, 0], sizes = [8, 64], strides = [1, 1]} : vector<128x64xf32> to vector<8x64xf32>
    %181 = arith.truncf %180 : vector<8x64xf32> to vector<8x64xbf16>
    %c11_109 = arith.constant 11 : index
    %c0_110 = arith.constant 0 : index
    %c0_111 = arith.constant 0 : index
    %182 = vector.load %arg8[%c11_109, %c0_110, %c0_111] : memref<16x64x128xbf16, #tpu.memory_space<vmem>>, vector<1x64x128xbf16>
    %183 = vector.shape_cast %182 : vector<1x64x128xbf16> to vector<64x128xbf16>
    %cst_112 = arith.constant dense<0.000000e+00> : vector<8x128xf32>
    %184 = tpu.matmul %181, %183, %cst_112 {dimension_numbers = #tpu.dot_dimension_numbers<[1], [0], [0], [1], [0, 0, 1, 1], [], []>} : vector<8x64xbf16>, vector<64x128xbf16>, vector<8x128xf32> -> vector<8x128xf32>
    %185 = arith.addf %179, %184 : vector<8x128xf32>
    %186 = vector.extract_strided_slice %114 {offsets = [96, 0], sizes = [8, 64], strides = [1, 1]} : vector<128x64xf32> to vector<8x64xf32>
    %187 = arith.truncf %186 : vector<8x64xf32> to vector<8x64xbf16>
    %c12_113 = arith.constant 12 : index
    %c0_114 = arith.constant 0 : index
    %c0_115 = arith.constant 0 : index
    %188 = vector.load %arg8[%c12_113, %c0_114, %c0_115] : memref<16x64x128xbf16, #tpu.memory_space<vmem>>, vector<1x64x128xbf16>
    %189 = vector.shape_cast %188 : vector<1x64x128xbf16> to vector<64x128xbf16>
    %cst_116 = arith.constant dense<0.000000e+00> : vector<8x128xf32>
    %190 = tpu.matmul %187, %189, %cst_116 {dimension_numbers = #tpu.dot_dimension_numbers<[1], [0], [0], [1], [0, 0, 1, 1], [], []>} : vector<8x64xbf16>, vector<64x128xbf16>, vector<8x128xf32> -> vector<8x128xf32>
    %191 = arith.addf %185, %190 : vector<8x128xf32>
    %192 = vector.extract_strided_slice %114 {offsets = [104, 0], sizes = [8, 64], strides = [1, 1]} : vector<128x64xf32> to vector<8x64xf32>
    %193 = arith.truncf %192 : vector<8x64xf32> to vector<8x64xbf16>
    %c13_117 = arith.constant 13 : index
    %c0_118 = arith.constant 0 : index
    %c0_119 = arith.constant 0 : index
    %194 = vector.load %arg8[%c13_117, %c0_118, %c0_119] : memref<16x64x128xbf16, #tpu.memory_space<vmem>>, vector<1x64x128xbf16>
    %195 = vector.shape_cast %194 : vector<1x64x128xbf16> to vector<64x128xbf16>
    %cst_120 = arith.constant dense<0.000000e+00> : vector<8x128xf32>
    %196 = tpu.matmul %193, %195, %cst_120 {dimension_numbers = #tpu.dot_dimension_numbers<[1], [0], [0], [1], [0, 0, 1, 1], [], []>} : vector<8x64xbf16>, vector<64x128xbf16>, vector<8x128xf32> -> vector<8x128xf32>
    %197 = arith.addf %191, %196 : vector<8x128xf32>
    %198 = vector.extract_strided_slice %114 {offsets = [112, 0], sizes = [8, 64], strides = [1, 1]} : vector<128x64xf32> to vector<8x64xf32>
    %199 = arith.truncf %198 : vector<8x64xf32> to vector<8x64xbf16>
    %c14_121 = arith.constant 14 : index
    %c0_122 = arith.constant 0 : index
    %c0_123 = arith.constant 0 : index
    %200 = vector.load %arg8[%c14_121, %c0_122, %c0_123] : memref<16x64x128xbf16, #tpu.memory_space<vmem>>, vector<1x64x128xbf16>
    %201 = vector.shape_cast %200 : vector<1x64x128xbf16> to vector<64x128xbf16>
    %cst_124 = arith.constant dense<0.000000e+00> : vector<8x128xf32>
    %202 = tpu.matmul %199, %201, %cst_124 {dimension_numbers = #tpu.dot_dimension_numbers<[1], [0], [0], [1], [0, 0, 1, 1], [], []>} : vector<8x64xbf16>, vector<64x128xbf16>, vector<8x128xf32> -> vector<8x128xf32>
    %203 = arith.addf %197, %202 : vector<8x128xf32>
    %204 = vector.extract_strided_slice %114 {offsets = [120, 0], sizes = [8, 64], strides = [1, 1]} : vector<128x64xf32> to vector<8x64xf32>
    %205 = arith.truncf %204 : vector<8x64xf32> to vector<8x64xbf16>
    %c15_125 = arith.constant 15 : index
    %c0_126 = arith.constant 0 : index
    %c0_127 = arith.constant 0 : index
    %206 = vector.load %arg8[%c15_125, %c0_126, %c0_127] : memref<16x64x128xbf16, #tpu.memory_space<vmem>>, vector<1x64x128xbf16>
    %207 = vector.shape_cast %206 : vector<1x64x128xbf16> to vector<64x128xbf16>
    %cst_128 = arith.constant dense<0.000000e+00> : vector<8x128xf32>
    %208 = tpu.matmul %205, %207, %cst_128 {dimension_numbers = #tpu.dot_dimension_numbers<[1], [0], [0], [1], [0, 0, 1, 1], [], []>} : vector<8x64xbf16>, vector<64x128xbf16>, vector<8x128xf32> -> vector<8x128xf32>
    %209 = arith.addf %203, %208 : vector<8x128xf32>
    %210 = vector.extract_strided_slice %209 {offsets = [0, 0], sizes = [4, 128], strides = [1, 1]} : vector<8x128xf32> to vector<4x128xf32>
    %c0_129 = arith.constant 0 : index
    %c0_130 = arith.constant 0 : index
    %211 = vector.load %arg9[%c0_129, %c0_130] : memref<1x128xf32, #tpu.memory_space<vmem>>, vector<1x128xf32>
    %212 = vector.broadcast %211 : vector<1x128xf32> to vector<4x128xf32>
    %213 = arith.addf %210, %212 : vector<4x128xf32>
    %cst_131 = arith.constant 0.000000e+00 : f32
    %214 = vector.broadcast %cst_131 : f32 to vector<4x128xf32>
    %215 = arith.maximumf %213, %214 : vector<4x128xf32>
    %cst_132 = arith.constant dense<0.000000e+00> : vector<128xf32>
    %216 = vector.multi_reduction <add>, %215, %cst_132 [0] : vector<4x128xf32> to vector<128xf32>
    %217 = vector.shape_cast %216 : vector<128xf32> to vector<1x128xf32>
    %cst_133 = arith.constant 4.000000e+00 : f32
    %218 = vector.broadcast %cst_133 : f32 to vector<1x128xf32>
    %219 = arith.divf %217, %218 : vector<1x128xf32>
    %c0_134 = arith.constant 0 : index
    %c0_135 = arith.constant 0 : index
    %220 = vector.load %arg10[%c0_134, %c0_135] : memref<128x2xf32, #tpu.memory_space<vmem>>, vector<128x2xf32>
    %cst_136 = arith.constant dense<0.000000e+00> : vector<1x2xf32>
    %221 = tpu.matmul %219, %220, %cst_136 {dimension_numbers = #tpu.dot_dimension_numbers<[1], [0], [0], [1], [0, 0, 1, 1], [], []>} : vector<1x128xf32>, vector<128x2xf32>, vector<1x2xf32> -> vector<1x2xf32>
    %c0_137 = arith.constant 0 : index
    %c0_138 = arith.constant 0 : index
    %222 = vector.load %arg11[%c0_137, %c0_138] : memref<1x2xf32, #tpu.memory_space<vmem>>, vector<1x2xf32>
    %223 = arith.addf %221, %222 : vector<1x2xf32>
    %c0_139 = arith.constant 0 : index
    %c0_140 = arith.constant 0 : index
    %c0_141 = arith.constant 0 : index
    %224 = vector.load %arg12[%c0_139, %c0_140, %c0_141] : memref<1x1x2xf32, #tpu.memory_space<vmem>>, vector<1x1x2xf32>
    %225 = vector.shape_cast %224 : vector<1x1x2xf32> to vector<1x2xf32>
    %226 = vector.shape_cast %223 : vector<1x2xf32> to vector<1x1x2xf32>
    tpu.vector_store %arg12[%c0_139, %c0_140, %c0_141], %226 {strides = array<i32>} : memref<1x1x2xf32, #tpu.memory_space<vmem>>, vector<1x1x2xf32>,
    return
  }
  func.func @transform_0(%arg0: i32) -> (i32, i32, i32) {
    %c0_i32 = arith.constant 0 : i32
    %c0_i32_0 = arith.constant 0 : i32
    %c0_i32_1 = arith.constant 0 : i32
    return %arg0, %c0_i32, %c0_i32_0 : i32, i32, i32
  }
  func.func @transform_1(%arg0: i32) -> (i32, i32) {
    %c0_i32 = arith.constant 0 : i32
    %c0_i32_0 = arith.constant 0 : i32
    %c0_i32_1 = arith.constant 0 : i32
    return %c0_i32, %c0_i32_0 : i32, i32
  }
  func.func @transform_2(%arg0: i32) -> (i32, i32) {
    %c0_i32 = arith.constant 0 : i32
    %c0_i32_0 = arith.constant 0 : i32
    %c0_i32_1 = arith.constant 0 : i32
    return %c0_i32, %c0_i32_0 : i32, i32
  }
  func.func @transform_3(%arg0: i32) -> (i32, i32) {
    %c0_i32 = arith.constant 0 : i32
    %c0_i32_0 = arith.constant 0 : i32
    %c0_i32_1 = arith.constant 0 : i32
    return %c0_i32, %c0_i32_0 : i32, i32
  }
  func.func @transform_4(%arg0: i32) -> (i32, i32, i32) {
    %c0_i32 = arith.constant 0 : i32
    %c0_i32_0 = arith.constant 0 : i32
    %c0_i32_1 = arith.constant 0 : i32
    %c0_i32_2 = arith.constant 0 : i32
    return %c0_i32, %c0_i32_0, %c0_i32_1 : i32, i32, i32
  }
  func.func @transform_5(%arg0: i32) -> (i32, i32) {
    %c0_i32 = arith.constant 0 : i32
    %c0_i32_0 = arith.constant 0 : i32
    %c0_i32_1 = arith.constant 0 : i32
    return %c0_i32, %c0_i32_0 : i32, i32
  }
  func.func @transform_6(%arg0: i32) -> (i32, i32) {
    %c0_i32 = arith.constant 0 : i32
    %c0_i32_0 = arith.constant 0 : i32
    %c0_i32_1 = arith.constant 0 : i32
    return %c0_i32, %c0_i32_0 : i32, i32
  }
  func.func @transform_7(%arg0: i32) -> (i32, i32, i32) {
    %c0_i32 = arith.constant 0 : i32
    %c0_i32_0 = arith.constant 0 : i32
    %c0_i32_1 = arith.constant 0 : i32
    %c0_i32_2 = arith.constant 0 : i32
    return %c0_i32, %c0_i32_0, %c0_i32_1 : i32, i32, i32
  }
  func.func @transform_8(%arg0: i32) -> (i32, i32) {
    %c0_i32 = arith.constant 0 : i32
    %c0_i32_0 = arith.constant 0 : i32
    %c0_i32_1 = arith.constant 0 : i32
    return %c0_i32, %c0_i32_0 : i32, i32
  }
  func.func @transform_9(%arg0: i32) -> (i32, i32) {
    %c0_i32 = arith.constant 0 : i32
    %c0_i32_0 = arith.constant 0 : i32
    %c0_i32_1 = arith.constant 0 : i32
    return %c0_i32, %c0_i32_0 : i32, i32
  }
  func.func @transform_10(%arg0: i32) -> (i32, i32) {
    %c0_i32 = arith.constant 0 : i32
    %c0_i32_0 = arith.constant 0 : i32
    %c0_i32_1 = arith.constant 0 : i32
    return %c0_i32, %c0_i32_0 : i32, i32
  }
  func.func @transform_11(%arg0: i32) -> (i32, i32, i32) {
    %c0_i32 = arith.constant 0 : i32
    %c0_i32_0 = arith.constant 0 : i32
    %c0_i32_1 = arith.constant 0 : i32
    return %arg0, %c0_i32, %c0_i32_0 : i32, i32, i32
  }
}

</mosaic_0001>

<bundles_post_ra>
// kernel: dp1_forward.1
= control target key start
LH: loop header
LB: loop body
LE: loop exit
PB: predicated region body
PF: predicated region fallthrough
CT: control target
= control target key end

     0   :  { %16 = vsyncpa [#allocation3], 0  ;;  %s5747_s0 = inlined_call_operand.vmem [shape: bf16[2,64,256], index: 0, kind: input, shape index: {}]   ;;  %s5748_s1 = inlined_call_operand.vmem [shape: bf16[256,32], index: 1, kind: input, shape index: {}]   ;;  %s5749_s2 = inlined_call_operand.vmem [shape: f32[1,32], index: 2, kind: input, shape index: {}]   ;;  %s5750_s3 = inlined_call_operand.vmem [shape: bf16[256,64], index: 3, kind: input, shape index: {}]   ;;  %s5751_s4 = inlined_call_operand.vmem [shape: bf16[16,32,64], index: 4, kind: input, shape index: {}]   ;;  %s5752_s5 = inlined_call_operand.vmem [shape: f32[1,64], index: 5, kind: input, shape index: {}]   ;;  %s5753_s6 = inlined_call_operand.vmem [shape: bf16[128,16], index: 6, kind: input, shape index: {}]   ;;  %s5754_s7 = inlined_call_operand.vmem [shape: bf16[16,64,128], index: 7, kind: input, shape index: {}]   ;;  %s5755_s8 = inlined_call_operand.vmem [shape: f32[1,128], index: 8, kind: input, shape index: {}]   ;;  %s5756_s9 = inlined_call_operand.vmem [shape: f32[128,2], index: 9, kind: input, shape index: {}]   ;;  %s5757_s10 = inlined_call_operand.vmem [shape: f32[1,2], index: 10, kind: input, shape index: {}]   ;;  %s5758_s11 = inlined_call_operand.hbm [shape: f32[2,1,2], index: 11, kind: output, shape index: {}]  }
   0x1   :  { %18 = vsyncpa [#allocation3 + $0x1], 0  ;;  %s4934_s17 = smov 0   ;;  %s4936_s18 = smov 0  }
   0x2   :  { %s4938_s19 = smov 0   ;;  %s4940_s20 = smov 0  }
   0x3 LB: > { %s4955_s21 = sadd.s32 4294967295, %s4869_s20   ;;  %s3598_s22 = sadd.s32 4294967294, %s4869_s20   ;;  %s4869_s20 = sphi %s4940_s20, %s5766_s20   ;;  %s4865_s19 = sphi %s4938_s19, %s5765_s19   ;;  %s4861_s18 = sphi %s4936_s18, %s5764_s18   ;;  %s4857_s17 = sphi %s4934_s17, %s5763_s17  }
   0x4   : > { %s4959_s23 = sadd.s32 1, %s4869_s20   ;;  %s267_s24 = sadd.s32 1, %s4865_s19 }
   0x5   : > { %s264_s25 = ssub.s32 %s4869_s20, %s4959_s23  ;;  %p277_p0 = scmp.ne.s32.totalorder %s4865_s19, %s4861_s18 }
   0x6   : > { %p265_p1 = scmp.eq.s32.totalorder %s264_s25, 0  ;;  %p278_p2 = scmp.eq.s32.totalorder %s4955_s21, 1 }
   0x7   : > { %p283_p3 = scmp.ne.s32.totalorder %s4861_s18, %s4857_s17  ;;  %p284_p4 = scmp.eq.s32.totalorder %s3598_s22, 1 }
   0x8   : > { %s4970_s26 = scalar_select %p265_p1, %s4865_s19, %s267_s24  }
   0x9   : > { %p4972_p5 = por %p278_p2, %p277_p0  ;;  %p4976_p6 = por %p284_p4, %p283_p3 }
   0xa   : > { %5759 = sst [smem:[#allocation5_spill]] %s4970_s26  ;;  %p3601_p7 = scmp.ge.s32.totalorder %s4869_s20, 1 }
   0xb   : > { %p340_p8 = scmp.lt.s32.totalorder %s4869_s20, 3 }
   0xd   : > { %p341_p9 = pnand %p3601_p7, %p340_p8 }
   0xe   : > { %p379_p10 = scmp.lt.s32.totalorder (!%p341_p9), %s4955_s21, 1 }
   0xf   : > { %344 = sbr.rel (%p341_p9) target bundleno = 1525 (0x5f5), region = 64 }
  0x14   : > { %v4661_v0 = vld [vmem:[%s5748_s1 + $0x78] sm:$0xff]   ;;  %v4663_v2 = vld [vmem:[%s5748_s1 + $0x70] sm:$0xff]   ;;  %v4665_v4 = vld [vmem:[%s5748_s1 + $0x68] sm:$0xff]   ;;  %s380_s12 = scalar_select %p379_p10, %s4955_s21, 1  ;;  %vm757_vm0 = vcmask 523264   ;;  %v4871_v26 = vmov 0.0  }
  0x15   : > { %v4662_v1 = vld [vmem:[%s5748_s1 + $0x38] sm:$0xff]   ;;  %3991 = vmatprep.subr.bf16.mxu0 %v4661_v0  ;;  %v4664_v3 = vld [vmem:[%s5748_s1 + $0x30] sm:$0xff]   ;;  %v4666_v5 = vld [vmem:[%s5748_s1 + $0x28] sm:$0xff]   ;;  %vm4872_vm1 = vmmov 0   ;;  %vm990_vm2 = vcmask 261120   ;;  %vm2055_vm3 = vcmask 130048  }
  0x16   : > { %3992 = vmatpush3.bf16.msra.mxu0 %v4662_v1  ;;  %v4667_v6 = vld [vmem:[%s5748_s1 + $0x60] sm:$0xff]   ;;  %s3990_s22 = sshll.u32 %s380_s12, 6  ;;  %v4669_v8 = vld [vmem:[%s5748_s1 + $0x58] sm:$0xff]   ;;  %v4671_v10 = vld [vmem:[%s5748_s1 + $0x50] sm:$0xff]   ;;  %vm3431_vm4 = vcmask 1043456   ;;  %vm3528_vm5 = vcmask 8192  }
  0x17   : > { %3993 = vmatprep.subr.bf16.mxu0 %v4663_v2  ;;  %v4668_v7 = vld [vmem:[%s5748_s1 + $0x20] sm:$0xff]   ;;  %s5014_s30 = scalar_lea.vmem %s5747_s0, %s3990_s22  ;;  %v4670_v9 = vld [vmem:[%s5748_s1 + $0x18] sm:$0xff]   ;;  %v4672_v12 = vld [vmem:[%s5748_s1 + $0x10] sm:$0xff]   ;;  %s377_s22 = sand.u32 1, %s4861_s18  }
  0x18   : > { %v4679_v11 = vld [vmem:[%s5014_s30 + $0x4] ss:$8 sps:$4 sm:$0xff]   ;;  %v4677_v17 = vld [vmem:[%s5014_s30] ss:$8 sps:$4 sm:$0xff]   ;;  %v4680_v18 = vld [vmem:[%s5014_s30 + $0x14] ss:$8 sps:$4 sm:$0xff]  }
  0x19   : > { %600 = vmatprep.mubr.bf16.mxu0 %v4679_v11  ;;  %v4673_v13 = vld [vmem:[%s5748_s1 + $0x48] sm:$0xff]   ;;  %v4675_v15 = vld [vmem:[%s5748_s1 + $0x40] sm:$0xff]   ;;  %v4682_v19 = vld [vmem:[%s5014_s30 + $0x10] ss:$8 sps:$4 sm:$0xff]   ;;  %s378_s13 = scalar_lea.vmem [#allocation2], %s377_s22  ;;  %s3531_s24 = scalar_lea.sflag [#allocation3], %s377_s22 }
  0x1a   : > { %3994 = vmatpush3.bf16.msra.mxu0 %v4664_v3  ;;  %v4674_v14 = vld [vmem:[%s5748_s1 + $0x8] sm:$0xff]   ;;  %v4676_v16 = vld [vmem:[%s5748_s1] sm:$0xff]   ;;  %v4686_v22 = vld [vmem:[%s5014_s30 + $0x34] ss:$8 sps:$4 sm:$0xff]   ;;  %s3543_s14 = sshll.u32 %s378_s13, 4  ;;  %s3544_s14 = int_to_ptr.vmem [resolvable:$true] %s3543_s14 }
  0x1b   : > { %3995 = vmatprep.subr.bf16.mxu0 %v4665_v4  ;;  %v4683_v20 = vld [vmem:[%s5014_s30 + $0x24] ss:$8 sps:$4 sm:$0xff]   ;;  %v4685_v21 = vld [vmem:[%s5014_s30 + $0x20] ss:$8 sps:$4 sm:$0xff]   ;;  %v4688_v23 = vld [vmem:[%s5014_s30 + $0x30] ss:$8 sps:$4 sm:$0xff]  }
  0x1c   : > { %v4689_v24 = vld [vmem:[%s5750_s3] sm:$0xff]   ;;  %v4706_v25 = vld [vmem:[%s5751_s4 + $0x18] sm:$0xff]   ;;  %v4707_v27 = vld [vmem:[%s5751_s4 + $0x10] sm:$0xff]   ;;  %s3987_s30 = sshll.u32 %s4955_s21, 4  ;;  %s4809_s26 = scalar_lea.vmem %s3544_s14, 16 }
  0x1d   : > { %4213 = vmatprep.mubr.msk.bf16.mxu1 %vm757_vm0, %v4689_v24  ;;  %v3604_v46 = vld [vmem:[%s5749_s2] ss:$0 sm:$0xff]  ;;  %v4705_v11 = vld [vmem:[%s5751_s4 + $0x38] sm:$0xff]   ;;  %v4703_v24 = vld [vmem:[%s5750_s3 + $0x70] sm:$0xff]   ;;  %s5712_s16 = scalar_lea.hbm %s5758_s11, %s3987_s30  ;;  %p4810_p11 = scmp.ne.s32.totalorder %s3544_s14, %s4809_s26 }
  0x1e   : > { %3996 = vmatpush3.bf16.msra.mxu0 %v4666_v5  ;;  %s4873_s21 = smov [#allocation2]  }
  0x1f   : > { %3997 = vmatprep.subr.bf16.mxu0 %v4667_v6  ;;  %p4811_p12 = pnand %p4810_p11, %p4972_p5  ;;  %s4813_s25 = sshll.u32 %s4873_s21, 4  ;;  %s4814_s25 = int_to_ptr.vmem [resolvable:$false] %s4813_s25 }
  0x20   : > { %s4815_s29 = scalar_lea.vmem %s4814_s25, 32  ;;  %p4816_p0 = scmp.lt.s32.totalorder %s3544_s14, %s4814_s25 }
  0x21   : > { %p4812_p13 = pneg %p4811_p12  ;;  %p4817_p1 = scmp.lt.s32.totalorder %s4815_s29, %s4809_s26 }
  0x22   : > { %3998 = vmatpush3.bf16.msra.mxu0 %v4668_v7 }
  0x23   : > { %3999 = vmatprep.subr.bf16.mxu0 %v4669_v8  ;;  %p4818_p2 = por %p4817_p1, %p4816_p0 }
  0x25   : > { %p4819_p3 = pnand %p4818_p2, %p4812_p13 }
  0x26   : > { %4000 = vmatpush3.bf16.msra.mxu0 %v4670_v9  ;;  %v4690_v9 = vld [vmem:[%s5750_s3 + $0x8] sm:$0xff]  }
  0x27   : > { %4001 = vmatprep.subr.bf16.mxu0 %v4671_v10  ;;  %v4691_v10 = vld [vmem:[%s5750_s3 + $0x10] sm:$0xff]  }
  0x2a   : > { %4002 = vmatpush3.bf16.msra.mxu0 %v4672_v12  ;;  %v4708_v12 = vld [vmem:[%s5751_s4 + $0x30] sm:$0xff]  }
  0x2b   : > { %4003 = vmatprep.subr.bf16.mxu0 %v4673_v13  ;;  %v4692_v13 = vld [vmem:[%s5750_s3 + $0x18] sm:$0xff]  }
  0x2e   : > { %4004 = vmatpush3.bf16.msra.mxu0 %v4674_v14  ;;  %v4693_v14 = vld [vmem:[%s5750_s3 + $0x20] sm:$0xff]  }
  0x2f   : > { %4005 = vmatprep.subr.bf16.mxu0 %v4675_v15  ;;  %v4694_v15 = vld [vmem:[%s5750_s3 + $0x28] sm:$0xff]  }
  0x32   : > { %4006 = vmatpush3.bf16.msra.mxu0 %v4676_v16  ;;  %v4695_v16 = vld [vmem:[%s5750_s3 + $0x30] sm:$0xff]  }
  0x33   : > { %4245 = vmatprep.subr.bf16.mxu0 %v4871_v26 }
  0x35   : > { %601 = vmatmul.mubr.bf16.vlgmr.msra.gmra.mxu0 %v4677_v17  ;;  %v4696_v17 = vld [vmem:[%s5750_s3 + $0x38] sm:$0xff]  }
  0x36   : > { %608 = vmatprep.mubr.bf16.mxu0 %v4680_v18  ;;  %4246 = vmatpush3.bf16.msra.mxu0 %v4706_v25  ;;  %v4697_v18 = vld [vmem:[%s5750_s3 + $0x40] sm:$0xff]   ;;  %v4704_v25 = vld [vmem:[%s5750_s3 + $0x78] sm:$0xff]  }
  0x37   : > { %4247 = vmatprep.subr.bf16.mxu0 %v4871_v26 }
  0x3a   : > { %4248 = vmatpush3.bf16.msra.mxu0 %v4707_v27 }
  0x3b   : > { %4253 = vmatprep.subr.bf16.mxu0 %v4871_v26 }
  0x3d   : > { %609 = vmatmul.mubr.bf16.gmra.mxu0 %v4682_v19  ;;  %v4698_v19 = vld [vmem:[%s5750_s3 + $0x48] sm:$0xff]  }
  0x3e   : > { %616 = vmatprep.mubr.bf16.mxu0 %v4683_v20  ;;  %v4699_v20 = vld [vmem:[%s5750_s3 + $0x50] sm:$0xff]  }
  0x45   : > { %617 = vmatmul.mubr.bf16.gmra.mxu0 %v4685_v21  ;;  %v4700_v21 = vld [vmem:[%s5750_s3 + $0x58] sm:$0xff]  }
  0x46   : > { %624 = vmatprep.mubr.bf16.mxu0 %v4686_v22  ;;  %v4701_v22 = vld [vmem:[%s5750_s3 + $0x60] sm:$0xff]  }
  0x4d   : > { %625 = vmatmul.mubr.bf16.gmra.mxu0 %v4688_v23  ;;  %v4702_v23 = vld [vmem:[%s5750_s3 + $0x68] sm:$0xff]  }
  0x4e   : > { %4249 = vmatprep.mubr.msk.bf16.mxu0 %vm4872_vm1, %v4871_v26 }
  0xf5   : > { %v4007_v28 = vpop.f32.mrf.mxu0 }
  0xf7   : > { %v4008_v29 = vpop.f32.mrf.mxu0 }
  0xf8   : > { %v4009_v60 = vadd.f32 %v4008_v29, %v4007_v28 }
  0xf9   : > { %v4010_v30 = vpop.f32.mrf.mxu0 }
  0xfa   : > { %v603_v3 = vadd.f32 %v4009_v60, %v3604_v46 }
  0xfb   : > { %v4011_v31 = vpop.f32.mrf.mxu0 }
  0xfc   : > { %v4012_v55 = vadd.f32 %v4011_v31, %v4010_v30  ;;  %v633_v7 = vmax.f32 %v603_v3, 0.0  ;;  %v4709_v30 = vld [vmem:[%s5751_s4 + $0x8] sm:$0xff]  }
  0xfd   : > { %v4013_v32 = vpop.f32.mrf.mxu0  ;;  %v4723_v3 = vld [vmem:[%s5751_s4 + $0x88] sm:$0xff]  }
  0xfe   : > { %v606_v0 = vadd.f32 %v4012_v55, %v3604_v46 }
  0xff   : > { %v4014_v33 = vpop.f32.mrf.mxu0 }
 0x100   : > { %v4015_v52 = vadd.f32 %v4014_v33, %v4013_v32  ;;  %v634_v5 = vmax.f32 %v606_v0, 0.0  ;;  %v4722_v0 = vld [vmem:[%s5751_s4 + $0x90] sm:$0xff]  }
 0x101   : > { %v4016_v34 = vpop.f32.mrf.mxu0 }
 0x102   : > { %v611_v61 = vadd.f32 %v4015_v52, %v3604_v46  ;;  %v641_v8 = vpack.c.bf16 %v634_v5, %v633_v7 }
 0x103   : > { %v4017_v35 = vpop.f32.mrf.mxu0 }
 0x104   : > { %v4018_v48 = vadd.f32 %v4017_v35, %v4016_v34  ;;  %v635_v4 = vmax.f32 %v611_v61, 0.0  ;;  %v4710_v34 = vld [vmem:[%s5751_s4] sm:$0xff]  }
 0x105   : > { %v4019_v36 = vpop.f32.mrf.mxu0 }
 0x106   : > { %v614_v56 = vadd.f32 %v4018_v48, %v3604_v46  ;;  %v4716_v48 = vld [vmem:[%s5751_s4 + $0x78] sm:$0xff]  }
 0x107   : > { %v4020_v37 = vpop.f32.mrf.mxu0 }
 0x108   : > { %v4021_v45 = vadd.f32 %v4020_v37, %v4019_v36  ;;  %v636_v1 = vmax.f32 %v614_v56, 0.0  ;;  %v4711_v37 = vld [vmem:[%s5751_s4 + $0x28] sm:$0xff]  }
 0x109   : > { %v4022_v38 = vpop.f32.mrf.mxu0 }
 0x10a   : > { %v619_v53 = vadd.f32 %v4021_v45, %v3604_v46  ;;  %v642_v6 = vpack.c.bf16 %v636_v1, %v635_v4  ;;  %v4724_v4 = vld [vmem:[%s5751_s4 + $0xb8] sm:$0xff]  }
 0x10b   : > { %v4023_v39 = vpop.f32.mrf.mxu0 }
 0x10c   : > { %v4024_v42 = vadd.f32 %v4023_v39, %v4022_v38  ;;  %v637_v62 = vmax.f32 %v619_v53, 0.0  ;;  %v4712_v38 = vld [vmem:[%s5751_s4 + $0x58] sm:$0xff]   ;;  %v4717_v53 = vld [vmem:[%s5751_s4 + $0x40] sm:$0xff]  }
 0x10d   : > { %v4025_v40 = vpop.f32.mrf.mxu0 }
 0x10e   : > { %v622_v49 = vadd.f32 %v4024_v42, %v3604_v46 }
 0x10f   : > { %v4026_v41 = vpop.f32.mrf.mxu0 }
 0x110   : > { %v4027_v43 = vadd.f32 %v4026_v41, %v4025_v40  ;;  %v638_v57 = vmax.f32 %v622_v49, 0.0 }
 0x111   : > { %v4028_v44 = vpop.f32.mrf.mxu0 }
 0x112   : > { %v627_v50 = vadd.f32 %v4027_v43, %v3604_v46  ;;  %v643_v2 = vpack.c.bf16 %v638_v57, %v637_v62  ;;  %v4713_v43 = vld [vmem:[%s5751_s4 + $0x20] sm:$0xff]   ;;  %v4719_v57 = vld [vmem:[%s5751_s4 + $0x68] sm:$0xff]  }
 0x113   : > { %v4029_v47 = vpop.f32.mrf.mxu0 }
 0x114   : > { %v4030_v51 = vadd.f32 %v4029_v47, %v4028_v44  ;;  %v639_v58 = vmax.f32 %v627_v50, 0.0  ;;  %v4714_v44 = vld [vmem:[%s5751_s4 + $0x50] sm:$0xff]   ;;  %v4715_v47 = vld [vmem:[%s5751_s4 + $0x48] sm:$0xff]  }
 0x116   : > { %v630_v54 = vadd.f32 %v4030_v51, %v3604_v46 }
 0x118   : > { %v640_v59 = vmax.f32 %v630_v54, 0.0  ;;  %v4718_v54 = vld [vmem:[%s5751_s4 + $0x70] sm:$0xff]  }
 0x11a   : > { %v644_v63 = vpack.c.bf16 %v640_v59, %v639_v58  ;;  %v4720_v58 = vld [vmem:[%s5751_s4 + $0x98] sm:$0xff]  }
 0x11c   : > { %4205 = vmatprep.subr.bf16.mxu1 %v644_v63 }
 0x11d   : > { %4206 = vmatpush3.bf16.msra.mxu1 %v644_v63  ;;  %v4721_v63 = vld [vmem:[%s5751_s4 + $0x60] sm:$0xff]  }
 0x11e   : > { %4207 = vmatprep.subr.bf16.mxu1 %v643_v2 }
 0x121   : > { %4208 = vmatpush3.bf16.msra.mxu1 %v643_v2 }
 0x122   : > { %4209 = vmatprep.subr.bf16.mxu1 %v642_v6 }
 0x125   : > { %4210 = vmatpush3.bf16.msra.mxu1 %v642_v6 }
 0x126   : > { %4211 = vmatprep.subr.bf16.mxu1 %v641_v8 }
 0x129   : > { %4212 = vmatpush3.bf16.msra.mxu1 %v641_v8 }
 0x12a   : > { %4269 = vmatprep.subr.bf16.mxu1 %v4871_v26 }
 0x12c   : > { %4214 = vmatmul.mubr.msk.bf16.vlgmr.msra.gmra.mxu1 %vm757_vm0, %v4690_v9  ;;  %v4725_v9 = vld [vmem:[%s5751_s4 + $0x80] sm:$0xff]  }
 0x12d   : > { %4217 = vmatprep.mubr.msk.bf16.mxu1 %vm757_vm0, %v4691_v10  ;;  %4270 = vmatpush3.bf16.msra.mxu1 %v4705_v11  ;;  %v4726_v10 = vld [vmem:[%s5751_s4 + $0xb0] sm:$0xff]  }
 0x12e   : > { %4271 = vmatprep.subr.bf16.mxu1 %v4871_v26 }
 0x131   : > { %4272 = vmatpush3.bf16.msra.mxu1 %v4708_v12 }
 0x132   : > { %4285 = vmatprep.subr.bf16.mxu1 %v4871_v26 }
 0x134   : > { %4218 = vmatmul.mubr.msk.bf16.gmra.mxu1 %vm757_vm0, %v4692_v13  ;;  %v4727_v13 = vld [vmem:[%s5751_s4 + $0xa8] sm:$0xff]  }
 0x135   : > { %4221 = vmatprep.mubr.msk.bf16.mxu1 %vm757_vm0, %v4693_v14  ;;  %v4728_v14 = vld [vmem:[%s5751_s4 + $0xd8] sm:$0xff]  }
 0x13c   : > { %4222 = vmatmul.mubr.msk.bf16.gmra.mxu1 %vm757_vm0, %v4694_v15 }
 0x13d   : > { %4225 = vmatprep.mubr.msk.bf16.mxu1 %vm757_vm0, %v4695_v16 }
 0x144   : > { %4226 = vmatmul.mubr.msk.bf16.gmra.mxu1 %vm757_vm0, %v4696_v17 }
 0x145   : > { %4229 = vmatprep.mubr.msk.bf16.mxu1 %vm757_vm0, %v4697_v18 }
 0x14c   : > { %4230 = vmatmul.mubr.msk.bf16.gmra.mxu1 %vm757_vm0, %v4698_v19  ;;  %v4729_v19 = vld [vmem:[%s5751_s4 + $0xa0] sm:$0xff]  }
 0x14d   : > { %4233 = vmatprep.mubr.msk.bf16.mxu1 %vm757_vm0, %v4699_v20  ;;  %v4730_v20 = vld [vmem:[%s5751_s4 + $0xd0] sm:$0xff]  }
 0x154   : > { %4234 = vmatmul.mubr.msk.bf16.gmra.mxu1 %vm757_vm0, %v4700_v21 }
 0x155   : > { %4237 = vmatprep.mubr.msk.bf16.mxu1 %vm757_vm0, %v4701_v22 }
 0x15c   : > { %4238 = vmatmul.mubr.msk.bf16.gmra.mxu1 %vm757_vm0, %v4702_v23  ;;  %v4731_v23 = vld [vmem:[%s5751_s4 + $0xc8] sm:$0xff]  }
 0x15d   : > { %4241 = vmatprep.mubr.msk.bf16.mxu1 %vm757_vm0, %v4703_v24  ;;  %v4732_v24 = vld [vmem:[%s5751_s4 + $0xf8] sm:$0xff]  }
 0x164   : > { %4242 = vmatmul.mubr.msk.bf16.gmra.mxu1 %vm757_vm0, %v4704_v25 }
 0x165   : > { %4273 = vmatprep.mubr.msk.bf16.mxu1 %vm4872_vm1, %v4871_v26 }
 0x1ec   : > { %v4215_v27 = vpop.f32.mrf.mxu1 }
 0x1ee   : > { %v840_v28 = vpop.f32.mrf.mxu1 }
 0x1f0   : > { %v4216_v29 = vpop.f32.mrf.mxu1 }
 0x1f1   : > { %v972_v31 = vpack.c.bf16 %v4216_v29, %v4215_v27 }
 0x1f2   : > { %v843_v32 = vpop.f32.mrf.mxu1 }
 0x1f3   : > { %4250 = vmatmul.mubr.msk.bf16.vlgmr.msra.gmra.mxu0 %vm990_vm2, %v972_v31  ;;  %v967_v39 = vpack.c.bf16 %v843_v32, %v840_v28  ;;  %v4734_v31 = vld [vmem:[%s5751_s4 + $0xf0] sm:$0xff]  }
 0x1f4   : > { %v4219_v33 = vpop.f32.mrf.mxu1  ;;  %4254 = vmatpush3.bf16.msra.mxu0 %v4709_v30  ;;  %4257 = vmatprep.mubr.msk.bf16.mxu0 %vm4872_vm1, %v4871_v26  ;;  %v4733_v30 = vld [vmem:[%s5751_s4 + $0xc0] sm:$0xff]  }
 0x1f5   : > { %4255 = vmatprep.subr.bf16.mxu0 %v4871_v26 }
 0x1f6   : > { %v856_v35 = vpop.f32.mrf.mxu1 }
 0x1f8   : > { %v4220_v36 = vpop.f32.mrf.mxu1  ;;  %4256 = vmatpush3.bf16.msra.mxu0 %v4710_v34  ;;  %v4735_v34 = vld [vmem:[%s5751_s4 + $0xe8] sm:$0xff]  }
 0x1f9   : > { %v1155_v40 = vpack.c.bf16 %v4220_v36, %v4219_v33  ;;  %4261 = vmatprep.subr.bf16.mxu0 %v4871_v26 }
 0x1fa   : > { %v859_v41 = vpop.f32.mrf.mxu1 }
 0x1fb   : > { %4258 = vmatmul.mubr.msk.bf16.vlgmr.msra.gmra.mxu0 %vm990_vm2, %v967_v39  ;;  %4274 = vmatmul.mubr.msk.bf16.vlgmr.msra.gmra.mxu1 %vm990_vm2, %v1155_v40  ;;  %v1091_v49 = vpack.c.bf16 %v859_v41, %v856_v35  ;;  %v4737_v40 = vld [vmem:[%s5753_s6] sm:$0xff]  }
 0x1fc   : > { %v4223_v42 = vpop.f32.mrf.mxu1  ;;  %4262 = vmatpush3.bf16.msra.mxu0 %v4711_v37  ;;  %4286 = vmatpush3.bf16.msra.mxu1 %v4712_v38  ;;  %v4736_v37 = vld [vmem:[%s5751_s4 + $0xe0] sm:$0xff]  }
 0x1fd   : > { %4263 = vmatprep.subr.bf16.mxu0 %v4871_v26  ;;  %4287 = vmatprep.subr.bf16.mxu1 %v4871_v26  ;;  %v4741_v41 = vld [vmem:[%s5753_s6 + $0x20] sm:$0xff]  }
 0x1fe   : > { %v872_v45 = vpop.f32.mrf.mxu1  ;;  %4265 = vmatprep.mubr.msk.bf16.mxu0 %vm4872_vm1, %v4871_v26  ;;  %4289 = vmatprep.mubr.msk.bf16.mxu1 %vm4872_vm1, %v4871_v26 }
 0x200   : > { %v4224_v46 = vpop.f32.mrf.mxu1  ;;  %4264 = vmatpush3.bf16.msra.mxu0 %v4713_v43  ;;  %4288 = vmatpush3.bf16.msra.mxu1 %v4714_v44 }
 0x201   : > { %v1283_v50 = vpack.c.bf16 %v4224_v46, %v4223_v42  ;;  %4277 = vmatprep.subr.bf16.mxu0 %v4871_v26  ;;  %4301 = vmatprep.subr.bf16.mxu1 %v4871_v26 }
 0x202   : > { %v875_v51 = vpop.f32.mrf.mxu1 }
 0x203   : > { %4266 = vmatmul.mubr.msk.bf16.vlgmr.msra.gmra.mxu0 %vm990_vm2, %v1091_v49  ;;  %4290 = vmatmul.mubr.msk.bf16.vlgmr.msra.gmra.mxu1 %vm990_vm2, %v1283_v50  ;;  %v1219_v59 = vpack.c.bf16 %v875_v51, %v872_v45 }
 0x204   : > { %v4227_v52 = vpop.f32.mrf.mxu1  ;;  %4278 = vmatpush3.bf16.msra.mxu0 %v4715_v47  ;;  %4302 = vmatpush3.bf16.msra.mxu1 %v4716_v48 }
 0x205   : > { %4279 = vmatprep.subr.bf16.mxu0 %v4871_v26  ;;  %4303 = vmatprep.subr.bf16.mxu1 %v4871_v26 }
 0x206   : > { %v888_v55 = vpop.f32.mrf.mxu1  ;;  %4281 = vmatprep.mubr.msk.bf16.mxu0 %vm4872_vm1, %v4871_v26  ;;  %4305 = vmatprep.mubr.msk.bf16.mxu1 %vm4872_vm1, %v4871_v26 }
 0x208   : > { %v4228_v56 = vpop.f32.mrf.mxu1  ;;  %4280 = vmatpush3.bf16.msra.mxu0 %v4717_v53  ;;  %4304 = vmatpush3.bf16.msra.mxu1 %v4718_v54 }
 0x209   : > { %v1411_v60 = vpack.c.bf16 %v4228_v56, %v4227_v52  ;;  %4293 = vmatprep.subr.bf16.mxu0 %v4871_v26  ;;  %4317 = vmatprep.subr.bf16.mxu1 %v4871_v26 }
 0x20a   : > { %v891_v61 = vpop.f32.mrf.mxu1 }
 0x20b   : > { %4282 = vmatmul.mubr.msk.bf16.vlgmr.msra.gmra.mxu0 %vm990_vm2, %v1219_v59  ;;  %4306 = vmatmul.mubr.msk.bf16.vlgmr.msra.gmra.mxu1 %vm990_vm2, %v1411_v60  ;;  %v1347_v5 = vpack.c.bf16 %v891_v61, %v888_v55 }
 0x20c   : > { %v4231_v62 = vpop.f32.mrf.mxu1  ;;  %4294 = vmatpush3.bf16.msra.mxu0 %v4719_v57  ;;  %4318 = vmatpush3.bf16.msra.mxu1 %v4720_v58 }
 0x20d   : > { %4295 = vmatprep.subr.bf16.mxu0 %v4871_v26  ;;  %4319 = vmatprep.subr.bf16.mxu1 %v4871_v26 }
 0x20e   : > { %v904_v1 = vpop.f32.mrf.mxu1  ;;  %4297 = vmatprep.mubr.msk.bf16.mxu0 %vm4872_vm1, %v4871_v26  ;;  %4321 = vmatprep.mubr.msk.bf16.mxu1 %vm4872_vm1, %v4871_v26 }
 0x210   : > { %v4232_v2 = vpop.f32.mrf.mxu1  ;;  %4296 = vmatpush3.bf16.msra.mxu0 %v4721_v63  ;;  %4320 = vmatpush3.bf16.msra.mxu1 %v4722_v0 }
 0x211   : > { %v1539_v6 = vpack.c.bf16 %v4232_v2, %v4231_v62  ;;  %4309 = vmatprep.subr.bf16.mxu0 %v4871_v26  ;;  %4333 = vmatprep.subr.bf16.mxu1 %v4871_v26 }
 0x212   : > { %v907_v7 = vpop.f32.mrf.mxu1 }
 0x213   : > { %4298 = vmatmul.mubr.msk.bf16.vlgmr.msra.gmra.mxu0 %vm990_vm2, %v1347_v5  ;;  %4322 = vmatmul.mubr.msk.bf16.vlgmr.msra.gmra.mxu1 %vm990_vm2, %v1539_v6  ;;  %v1475_v15 = vpack.c.bf16 %v907_v7, %v904_v1 }
 0x214   : > { %v4235_v8 = vpop.f32.mrf.mxu1  ;;  %4310 = vmatpush3.bf16.msra.mxu0 %v4723_v3  ;;  %4334 = vmatpush3.bf16.msra.mxu1 %v4724_v4 }
 0x215   : > { %4311 = vmatprep.subr.bf16.mxu0 %v4871_v26  ;;  %4335 = vmatprep.subr.bf16.mxu1 %v4871_v26 }
 0x216   : > { %v920_v11 = vpop.f32.mrf.mxu1  ;;  %4313 = vmatprep.mubr.msk.bf16.mxu0 %vm4872_vm1, %v4871_v26  ;;  %4337 = vmatprep.mubr.msk.bf16.mxu1 %vm4872_vm1, %v4871_v26 }
 0x218   : > { %v4236_v12 = vpop.f32.mrf.mxu1  ;;  %4312 = vmatpush3.bf16.msra.mxu0 %v4725_v9  ;;  %4336 = vmatpush3.bf16.msra.mxu1 %v4726_v10 }
 0x219   : > { %v1667_v16 = vpack.c.bf16 %v4236_v12, %v4235_v8  ;;  %4325 = vmatprep.subr.bf16.mxu0 %v4871_v26  ;;  %4349 = vmatprep.subr.bf16.mxu1 %v4871_v26 }
 0x21a   : > { %v923_v17 = vpop.f32.mrf.mxu1 }
 0x21b   : > { %4314 = vmatmul.mubr.msk.bf16.vlgmr.msra.gmra.mxu0 %vm990_vm2, %v1475_v15  ;;  %4338 = vmatmul.mubr.msk.bf16.vlgmr.msra.gmra.mxu1 %vm990_vm2, %v1667_v16  ;;  %v1603_v25 = vpack.c.bf16 %v923_v17, %v920_v11 }
 0x21c   : > { %v4239_v18 = vpop.f32.mrf.mxu1  ;;  %4326 = vmatpush3.bf16.msra.mxu0 %v4727_v13  ;;  %4350 = vmatpush3.bf16.msra.mxu1 %v4728_v14 }
 0x21d   : > { %4327 = vmatprep.subr.bf16.mxu0 %v4871_v26  ;;  %4351 = vmatprep.subr.bf16.mxu1 %v4871_v26 }
 0x21e   : > { %v936_v21 = vpop.f32.mrf.mxu1  ;;  %4329 = vmatprep.mubr.msk.bf16.mxu0 %vm4872_vm1, %v4871_v26  ;;  %4353 = vmatprep.mubr.msk.bf16.mxu1 %vm4872_vm1, %v4871_v26 }
 0x220   : > { %v4240_v22 = vpop.f32.mrf.mxu1  ;;  %4328 = vmatpush3.bf16.msra.mxu0 %v4729_v19  ;;  %4352 = vmatpush3.bf16.msra.mxu1 %v4730_v20 }
 0x221   : > { %v1795_v27 = vpack.c.bf16 %v4240_v22, %v4239_v18  ;;  %4341 = vmatprep.subr.bf16.mxu0 %v4871_v26  ;;  %4365 = vmatprep.subr.bf16.mxu1 %v4871_v26 }
 0x222   : > { %v939_v28 = vpop.f32.mrf.mxu1 }
 0x223   : > { %4330 = vmatmul.mubr.msk.bf16.vlgmr.msra.gmra.mxu0 %vm990_vm2, %v1603_v25  ;;  %4354 = vmatmul.mubr.msk.bf16.vlgmr.msra.gmra.mxu1 %vm990_vm2, %v1795_v27  ;;  %v1731_v35 = vpack.c.bf16 %v939_v28, %v936_v21 }
 0x224   : > { %v4243_v29 = vpop.f32.mrf.mxu1  ;;  %4342 = vmatpush3.bf16.msra.mxu0 %v4731_v23  ;;  %4366 = vmatpush3.bf16.msra.mxu1 %v4732_v24 }
 0x225   : > { %4343 = vmatprep.subr.bf16.mxu0 %v4871_v26  ;;  %4367 = vmatprep.subr.bf16.mxu1 %v4871_v26 }
 0x226   : > { %v952_v32 = vpop.f32.mrf.mxu1  ;;  %4345 = vmatprep.mubr.msk.bf16.mxu0 %vm4872_vm1, %v4871_v26  ;;  %4369 = vmatprep.mubr.msk.bf16.mxu1 %vm4872_vm1, %v4871_v26 }
 0x228   : > { %v4244_v33 = vpop.f32.mrf.mxu1  ;;  %4344 = vmatpush3.bf16.msra.mxu0 %v4733_v30  ;;  %4368 = vmatpush3.bf16.msra.mxu1 %v4734_v31 }
 0x229   : > { %v1923_v36 = vpack.c.bf16 %v4244_v33, %v4243_v29  ;;  %4357 = vmatprep.subr.bf16.mxu0 %v4871_v26 }
 0x22a   : > { %v955_v38 = vpop.f32.mrf.mxu1 }
 0x22b   : > { %4346 = vmatmul.mubr.msk.bf16.vlgmr.msra.gmra.mxu0 %vm990_vm2, %v1731_v35  ;;  %4370 = vmatmul.mubr.msk.bf16.vlgmr.msra.gmra.mxu1 %vm990_vm2, %v1923_v36  ;;  %v1859_v39 = vpack.c.bf16 %v955_v38, %v952_v32 }
 0x22c   : > { %4358 = vmatpush3.bf16.msra.mxu0 %v4735_v34  ;;  %4361 = vmatprep.mubr.msk.bf16.mxu0 %vm4872_vm1, %v4871_v26 }
 0x22d   : > { %4359 = vmatprep.subr.bf16.mxu0 %v4871_v26  ;;  %4383 = vmatprep.mubr.msk.bf16.mxu1 %vm2055_vm3, %v4741_v41 }
 0x230   : > { %4360 = vmatpush3.bf16.msra.mxu0 %v4736_v37 }
 0x233   : > { %4362 = vmatmul.mubr.msk.bf16.vlgmr.msra.gmra.mxu0 %vm990_vm2, %v1859_v39 }
 0x234   : > { %4375 = vmatprep.mubr.msk.bf16.mxu0 %vm2055_vm3, %v4737_v40 }
 0x2b3   : > { %v1028_v42 = vpop.f32.mrf.mxu0 }
 0x2b5   : > { %v4251_v43 = vpop.f32.mrf.mxu0 }
 0x2b7   : > { %v1031_v44 = vpop.f32.mrf.mxu0 }
 0x2b9   : > { %v4252_v45 = vpop.f32.mrf.mxu0 }
 0x2bb   : > { %v1084_v46 = vpop.f32.mrf.mxu0  ;;  %v1210_v47 = vpop.f32.mrf.mxu1 }
 0x2bc   : > { %v1085_v2 = vadd.f32 %v1084_v46, %v1028_v42 }
 0x2bd   : > { %v4259_v48 = vpop.f32.mrf.mxu0  ;;  %v4275_v49 = vpop.f32.mrf.mxu1 }
 0x2bf   : > { %v1087_v50 = vpop.f32.mrf.mxu0  ;;  %v1213_v51 = vpop.f32.mrf.mxu1 }
 0x2c0   : > { %v1088_v8 = vadd.f32 %v1087_v50, %v1031_v44 }
 0x2c1   : > { %v4260_v52 = vpop.f32.mrf.mxu0  ;;  %v4276_v53 = vpop.f32.mrf.mxu1 }
 0x2c3   : > { %v1146_v54 = vpop.f32.mrf.mxu0  ;;  %v1338_v55 = vpop.f32.mrf.mxu1 }
 0x2c4   : > { %v1153_v5 = vadd.f32 %v1146_v54, %v1085_v2 }
 0x2c5   : > { %v4267_v56 = vpop.f32.mrf.mxu0  ;;  %v4291_v57 = vpop.f32.mrf.mxu1 }
 0x2c6   : > { %v1217_v12 = vadd.f32 %v1210_v47, %v1153_v5  ;;  %v3769_v5 = vld [vmem:[%s5752_s5] ss:$0 sm:$0xff] }
 0x2c7   : > { %v1149_v58 = vpop.f32.mrf.mxu0  ;;  %v1341_v59 = vpop.f32.mrf.mxu1 }
 0x2c8   : > { %v1154_v11 = vadd.f32 %v1149_v58, %v1088_v8 }
 0x2c9   : > { %v4268_v60 = vpop.f32.mrf.mxu0  ;;  %v4292_v61 = vpop.f32.mrf.mxu1 }
 0x2ca   : > { %v1218_v18 = vadd.f32 %v1213_v51, %v1154_v11 }
 0x2cb   : > { %v1274_v62 = vpop.f32.mrf.mxu0  ;;  %v1466_v63 = vpop.f32.mrf.mxu1 }
 0x2cc   : > { %v1281_v15 = vadd.f32 %v1274_v62, %v1217_v12 }
 0x2cd   : > { %v4283_v0 = vpop.f32.mrf.mxu0  ;;  %v4307_v1 = vpop.f32.mrf.mxu1 }
 0x2ce   : > { %v1345_v22 = vadd.f32 %v1338_v55, %v1281_v15  ;;  %v4738_v15 = vld [vmem:[%s5753_s6 + $0x8] sm:$0xff]  }
 0x2cf   : > { %v1277_v3 = vpop.f32.mrf.mxu0  ;;  %v1469_v4 = vpop.f32.mrf.mxu1 }
 0x2d0   : > { %v1282_v21 = vadd.f32 %v1277_v3, %v1218_v18  ;;  %v4743_v18 = vld [vmem:[%s5753_s6 + $0x30] sm:$0xff]  }
 0x2d1   : > { %v4284_v6 = vpop.f32.mrf.mxu0  ;;  %v4308_v7 = vpop.f32.mrf.mxu1 }
 0x2d2   : > { %v1346_v29 = vadd.f32 %v1341_v59, %v1282_v21  ;;  %v4746_v21 = vld [vmem:[%s5754_s7 + $0x50] sm:$0xff]  }
 0x2d3   : > { %v1402_v9 = vpop.f32.mrf.mxu0  ;;  %v1594_v10 = vpop.f32.mrf.mxu1 }
 0x2d4   : > { %v1409_v25 = vadd.f32 %v1402_v9, %v1345_v22  ;;  %v4749_v22 = vld [vmem:[%s5754_s7 + $0x30] sm:$0xff]  }
 0x2d5   : > { %v4299_v13 = vpop.f32.mrf.mxu0  ;;  %v4323_v14 = vpop.f32.mrf.mxu1 }
 0x2d6   : > { %v1473_v33 = vadd.f32 %v1466_v63, %v1409_v25  ;;  %v4748_v25 = vld [vmem:[%s5754_s7 + $0x48] sm:$0xff]  }
 0x2d7   : > { %v1405_v16 = vpop.f32.mrf.mxu0  ;;  %v1597_v17 = vpop.f32.mrf.mxu1 }
 0x2d8   : > { %v1410_v32 = vadd.f32 %v1405_v16, %v1346_v29  ;;  %v4742_v16 = vld [vmem:[%s5753_s6 + $0x28] sm:$0xff]   ;;  %v4752_v29 = vld [vmem:[%s5754_s7 + $0x20] sm:$0xff]  }
 0x2d9   : > { %v4300_v19 = vpop.f32.mrf.mxu0  ;;  %v4324_v20 = vpop.f32.mrf.mxu1 }
 0x2da   : > { %v1474_v39 = vadd.f32 %v1469_v4, %v1410_v32  ;;  %v4745_v19 = vld [vmem:[%s5754_s7 + $0x58] sm:$0xff]  }
 0x2db   : > { %v1530_v23 = vpop.f32.mrf.mxu0  ;;  %v1722_v24 = vpop.f32.mrf.mxu1  ;;  %v4747_v20 = vld [vmem:[%s5754_s7 + $0x38] sm:$0xff]  }
 0x2dc   : > { %v1537_v36 = vadd.f32 %v1530_v23, %v1473_v33  ;;  %v4740_v23 = vld [vmem:[%s5753_s6 + $0x18] sm:$0xff]  }
 0x2dd   : > { %v4315_v27 = vpop.f32.mrf.mxu0  ;;  %v4339_v28 = vpop.f32.mrf.mxu1 }
 0x2de   : > { %v1601_v43 = vadd.f32 %v1594_v10, %v1537_v36  ;;  %v4750_v27 = vld [vmem:[%s5754_s7 + $0x40] sm:$0xff]   ;;  %v4751_v28 = vld [vmem:[%s5754_s7 + $0x28] sm:$0xff]  }
 0x2df   : > { %v1533_v30 = vpop.f32.mrf.mxu0  ;;  %v1725_v31 = vpop.f32.mrf.mxu1 }
 0x2e0   : > { %v1538_v42 = vadd.f32 %v1533_v30, %v1474_v39  ;;  %v4760_v39 = vld [vmem:[%s5754_s7 + $0x88] sm:$0xff]  }
 0x2e1   : > { %v4316_v34 = vpop.f32.mrf.mxu0  ;;  %v4340_v35 = vpop.f32.mrf.mxu1 }
 0x2e2   : > { %v1602_v49 = vadd.f32 %v1597_v17, %v1538_v42  ;;  %v4739_v17 = vld [vmem:[%s5753_s6 + $0x10] sm:$0xff]   ;;  %v4762_v42 = vld [vmem:[%s5754_s7 + $0x80] sm:$0xff]  }
 0x2e3   : > { %v1658_v37 = vpop.f32.mrf.mxu0  ;;  %v1850_v38 = vpop.f32.mrf.mxu1  ;;  %v4758_v35 = vld [vmem:[%s5754_s7 + $0x90] sm:$0xff]  }
 0x2e4   : > { %v1665_v46 = vadd.f32 %v1658_v37, %v1601_v43  ;;  %v4753_v37 = vld [vmem:[%s5754_s7 + $0x18] sm:$0xff]  }
 0x2e5   : > { %v4331_v40 = vpop.f32.mrf.mxu0  ;;  %v4355_v41 = vpop.f32.mrf.mxu1 }
 0x2e6   : > { %v1729_v53 = vadd.f32 %v1722_v24, %v1665_v46  ;;  %v4744_v24 = vld [vmem:[%s5753_s6 + $0x38] sm:$0xff]   ;;  %v4754_v41 = vld [vmem:[%s5754_s7 + $0x10] sm:$0xff]  }
 0x2e7   : > { %v1661_v44 = vpop.f32.mrf.mxu0  ;;  %v1853_v45 = vpop.f32.mrf.mxu1  ;;  %v4764_v46 = vld [vmem:[%s5754_s7 + $0xd8] sm:$0xff]  }
 0x2e8   : > { %v1666_v52 = vadd.f32 %v1661_v44, %v1602_v49  ;;  %v4755_v44 = vld [vmem:[%s5754_s7 + $0x8] sm:$0xff]   ;;  %v4759_v49 = vld [vmem:[%s5754_s7 + $0x78] sm:$0xff]  }
 0x2e9   : > { %v4332_v47 = vpop.f32.mrf.mxu0  ;;  %v4356_v48 = vpop.f32.mrf.mxu1 }
 0x2ea   : > { %v1730_v59 = vadd.f32 %v1725_v31, %v1666_v52  ;;  %v4756_v31 = vld [vmem:[%s5754_s7 + $0x98] sm:$0xff]   ;;  %v4757_v47 = vld [vmem:[%s5754_s7] sm:$0xff]   ;;  %v4766_v48 = vld [vmem:[%s5754_s7 + $0xd0] sm:$0xff]  }
 0x2eb   : > { %v1786_v50 = vpop.f32.mrf.mxu0  ;;  %v1978_v51 = vpop.f32.mrf.mxu1  ;;  %v4761_v52 = vld [vmem:[%s5754_s7 + $0x70] sm:$0xff]  }
 0x2ec   : > { %v1793_v56 = vadd.f32 %v1786_v50, %v1729_v53  ;;  %v4770_v53 = vld [vmem:[%s5754_s7 + $0xc0] sm:$0xff]  }
 0x2ed   : > { %v4347_v54 = vpop.f32.mrf.mxu0  ;;  %v4371_v55 = vpop.f32.mrf.mxu1 }
 0x2ee   : > { %v1857_v63 = vadd.f32 %v1850_v38, %v1793_v56  ;;  %v4763_v54 = vld [vmem:[%s5754_s7 + $0x68] sm:$0xff]   ;;  %v4772_v56 = vld [vmem:[%s5754_s7 + $0x118] sm:$0xff]  }
 0x2ef   : > { %v1789_v57 = vpop.f32.mrf.mxu0  ;;  %v1981_v58 = vpop.f32.mrf.mxu1 }
 0x2f0   : > { %v1794_v62 = vadd.f32 %v1789_v57, %v1730_v59  ;;  %v4765_v57 = vld [vmem:[%s5754_s7 + $0x60] sm:$0xff]   ;;  %v4767_v59 = vld [vmem:[%s5754_s7 + $0xb8] sm:$0xff]  }
 0x2f1   : > { %v4348_v60 = vpop.f32.mrf.mxu0  ;;  %v4372_v61 = vpop.f32.mrf.mxu1 }
 0x2f2   : > { %v1858_v4 = vadd.f32 %v1853_v45, %v1794_v62  ;;  %v4776_v61 = vld [vmem:[%s5754_s7 + $0x108] sm:$0xff]  }
 0x2f3   : > { %v1914_v0 = vpop.f32.mrf.mxu0 }
 0x2f4   : > { %v1921_v1 = vadd.f32 %v1914_v0, %v1857_v63  ;;  %v4769_v63 = vld [vmem:[%s5754_s7 + $0xb0] sm:$0xff]   ;;  %v4778_v0 = vld [vmem:[%s5754_s7 + $0x100] sm:$0xff]  }
 0x2f5   : > { %v4363_v2 = vpop.f32.mrf.mxu0 }
 0x2f6   : > { %v1985_v3 = vadd.f32 %v1978_v51, %v1921_v1  ;;  %v4768_v51 = vld [vmem:[%s5754_s7 + $0xc8] sm:$0xff]  }
 0x2f7   : > { %v1917_v6 = vpop.f32.mrf.mxu0  ;;  %v4771_v2 = vld [vmem:[%s5754_s7 + $0xa8] sm:$0xff]  }
 0x2f8   : > { %v1922_v7 = vadd.f32 %v1917_v6, %v1858_v4  ;;  %v1994_v9 = vadd.f32 %v3769_v5, %v1985_v3  ;;  %v4773_v6 = vld [vmem:[%s5754_s7 + $0xa0] sm:$0xff]  }
 0x2f9   : > { %v4364_v8 = vpop.f32.mrf.mxu0 }
 0x2fa   : > { %v1986_v10 = vadd.f32 %v1981_v58, %v1922_v7  ;;  %v1996_v12 = vmax.f32 %v1994_v9, 0.0  ;;  %v4774_v58 = vld [vmem:[%s5754_s7 + $0x110] sm:$0xff]   ;;  %v4775_v9 = vld [vmem:[%s5754_s7 + $0xf8] sm:$0xff]  }
 0x2fb   : > { %v4782_v8 = vld [vmem:[%s5754_s7 + $0x150] sm:$0xff]  }
 0x2fc   : > { %v1995_v11 = vadd.f32 %v3769_v5, %v1986_v10  ;;  %v4780_v5 = vld [vmem:[%s5754_s7 + $0x158] sm:$0xff]  }
 0x2fe   : > { %v1997_v13 = vmax.f32 %v1995_v11, 0.0  ;;  %v4784_v11 = vld [vmem:[%s5754_s7 + $0x148] sm:$0xff]  }
 0x300   : > { %v1998_v14 = vpack.c.bf16 %v1997_v13, %v1996_v12  ;;  %v4777_v12 = vld [vmem:[%s5754_s7 + $0xf0] sm:$0xff]   ;;  %v4786_v13 = vld [vmem:[%s5754_s7 + $0x140] sm:$0xff]  }
 0x302   : > { %4373 = vmatprep.subr.bf16.mxu0 %v1998_v14  ;;  %4618 = vmatprep.subr.bf16.mxu1 %v1998_v14 }
 0x303   : > { %4374 = vmatpush3.bf16.msra.mxu0 %v1998_v14  ;;  %4619 = vmatpush3.bf16.msra.mxu1 %v1998_v14  ;;  %v4779_v14 = vld [vmem:[%s5754_s7 + $0xe8] sm:$0xff]  }
 0x304   : > { %4415 = vmatprep.subr.bf16.mxu0 %v4871_v26  ;;  %4391 = vmatprep.subr.bf16.mxu1 %v4871_v26 }
 0x306   : > { %4376 = vmatmul.mubr.msk.bf16.vlgmr.msra.gmra.mxu0 %vm2055_vm3, %v4738_v15  ;;  %4384 = vmatmul.mubr.msk.bf16.vlgmr.msra.gmra.mxu1 %vm2055_vm3, %v4742_v16  ;;  %v4788_v16 = vld [vmem:[%s5754_s7 + $0x198] sm:$0xff]  }
 0x307   : > { %4379 = vmatprep.mubr.msk.bf16.mxu0 %vm2055_vm3, %v4739_v17  ;;  %4387 = vmatprep.mubr.msk.bf16.mxu1 %vm2055_vm3, %v4743_v18  ;;  %v4781_v17 = vld [vmem:[%s5754_s7 + $0xe0] sm:$0xff]  }
 0x308   : > { %4416 = vmatpush3.bf16.msra.mxu0 %v4745_v19  ;;  %4392 = vmatpush3.bf16.msra.mxu1 %v4747_v20  ;;  %v4790_v19 = vld [vmem:[%s5754_s7 + $0x190] sm:$0xff]   ;;  %v4783_v20 = vld [vmem:[%s5754_s7 + $0x138] sm:$0xff]  }
 0x309   : > { %4417 = vmatprep.subr.bf16.mxu0 %v4871_v26  ;;  %4393 = vmatprep.subr.bf16.mxu1 %v4871_v26 }
 0x30c   : > { %4418 = vmatpush3.bf16.msra.mxu0 %v4746_v21  ;;  %4394 = vmatpush3.bf16.msra.mxu1 %v4749_v22 }
 0x30d   : > { %4419 = vmatprep.subr.bf16.mxu0 %v4871_v26  ;;  %4395 = vmatprep.subr.bf16.mxu1 %v4871_v26 }
 0x30e   : > { %4380 = vmatmul.mubr.msk.bf16.gmra.mxu0 %vm2055_vm3, %v4740_v23  ;;  %4388 = vmatmul.mubr.msk.bf16.gmra.mxu1 %vm2055_vm3, %v4744_v24  ;;  %v4792_v23 = vld [vmem:[%s5754_s7 + $0x188] sm:$0xff]  }
 0x30f   : > { %4423 = vmatprep.mubr.msk.bf16.mxu0 %vm4872_vm1, %v4871_v26  ;;  %4399 = vmatprep.mubr.msk.bf16.mxu1 %vm4872_vm1, %v4871_v26 }
 0x310   : > { %4420 = vmatpush3.bf16.msra.mxu0 %v4748_v25  ;;  %4396 = vmatpush3.bf16.msra.mxu1 %v4751_v28  ;;  %v4785_v25 = vld [vmem:[%s5754_s7 + $0x130] sm:$0xff]  }
 0x311   : > { %4421 = vmatprep.subr.bf16.mxu0 %v4871_v26  ;;  %4397 = vmatprep.subr.bf16.mxu1 %v4871_v26 }
 0x314   : > { %4422 = vmatpush3.bf16.msra.mxu0 %v4750_v27  ;;  %4398 = vmatpush3.bf16.msra.mxu1 %v4752_v29  ;;  %v4794_v27 = vld [vmem:[%s5754_s7 + $0x180] sm:$0xff]   ;;  %v4787_v29 = vld [vmem:[%s5754_s7 + $0x128] sm:$0xff]  }
 0x315   : > { %4439 = vmatprep.subr.bf16.mxu0 %v4871_v26  ;;  %4403 = vmatprep.subr.bf16.mxu1 %v4871_v26 }
 0x3c6   : > { %v4377_v30 = vpop.f32.mrf.mxu0  ;;  %v4385_v62 = vpop.f32.mrf.mxu1 }
 0x3c7   : > { %v2330_v32 = vpack.c.bf16 %v4377_v30, %v4377_v30  ;;  %v2954_v15 = vpack.c.bf16 %v4385_v62, %v4385_v62 }
 0x3c8   : > { %v2114_v33 = vpop.f32.mrf.mxu0  ;;  %v2146_v1 = vpop.f32.mrf.mxu1 }
 0x3c9   : > { %4424 = vmatmul.mubr.msk.bf16.vlgmr.msra.gmra.mxu0 %vm757_vm0, %v2330_v32  ;;  %v2177_v50 = vpack.c.bf16 %v2114_v33, %v2114_v33  ;;  %v2798_v3 = vpack.c.bf16 %v2146_v1, %v2146_v1  ;;  %v4789_v32 = vld [vmem:[%s5754_s7 + $0x120] sm:$0xff]   ;;  %v4798_v33 = vld [vmem:[%s5754_s7 + $0x1d0] sm:$0xff]  }
 0x3ca   : > { %v5365_v34 = vpop.f32.mrf.mxu0  ;;  %4440 = vmatpush3.bf16.msra.mxu0 %v4756_v31  ;;  %4447 = vmatprep.mubr.msk.bf16.mxu0 %vm4872_vm1, %v4871_v26  ;;  %v5518_v18 = vpop.f32.mrf.mxu1  ;;  %v4796_v31 = vld [vmem:[%s5754_s7 + $0x1d8] sm:$0xff]   ;;  %v3451_v1 = vld [vmem:[%s5756_s9 + $0x50] sm:$0xff] }
 0x3cb   : > { %4441 = vmatprep.subr.bf16.mxu0 %v4871_v26  ;;  %v2408_v60 = vpack.c.bf16 %v5365_v34, %v5365_v34  ;;  %v4791_v34 = vld [vmem:[%s5754_s7 + $0x178] sm:$0xff]  }
 0x3cc   : > { %v2117_v36 = vpop.f32.mrf.mxu0  ;;  %v2149_v21 = vpop.f32.mrf.mxu1 }
 0x3cd   : > { %v2186_v38 = vpack.c.bf16 %v2117_v36, %v2117_v36  ;;  %v4800_v36 = vld [vmem:[%s5754_s7 + $0x1c8] sm:$0xff]  }
 0x3ce   : > { %4442 = vmatpush3.bf16.msra.mxu0 %v4758_v35  ;;  %v4381_v40 = vpop.f32.mrf.mxu0  ;;  %v4389_v24 = vpop.f32.mrf.mxu1  ;;  %v2876_v35 = vpack.c.bf16 %v2149_v21, %v2149_v21  ;;  %v3441_v21 = vld [vmem:[%s5756_s9] sm:$0xff] }
 0x3cf   : > { %4400 = vmatmul.mubr.msk.bf16.vlgmr.msra.gmra.mxu1 %vm757_vm0, %v2186_v38  ;;  %4443 = vmatprep.subr.bf16.mxu0 %v4871_v26  ;;  %v2642_v55 = vpack.c.bf16 %v4381_v40, %v4381_v40  ;;  %v4802_v38 = vld [vmem:[%s5754_s7 + $0x1c0] sm:$0xff]   ;;  %v3266_v40 = vpack.c.bf16 %v4389_v24, %v4389_v24 }
 0x3d0   : > { %4404 = vmatpush3.bf16.msra.mxu1 %v4753_v37  ;;  %4411 = vmatprep.mubr.msk.bf16.mxu1 %vm4872_vm1, %v4871_v26  ;;  %v2130_v43 = vpop.f32.mrf.mxu0  ;;  %v2162_v28 = vpop.f32.mrf.mxu1  ;;  %v4793_v37 = vld [vmem:[%s5754_s7 + $0x170] sm:$0xff]  }
 0x3d1   : > { %4405 = vmatprep.subr.bf16.mxu1 %v4871_v26  ;;  %v2486_v45 = vpack.c.bf16 %v2130_v43, %v2130_v43  ;;  %v3110_v30 = vpack.c.bf16 %v2162_v28, %v2162_v28  ;;  %v3032_v43 = vpack.c.bf16 %v5518_v18, %v5518_v18  ;;  %v3442_v18 = vld [vmem:[%s5756_s9 + $0x8] sm:$0xff] }
 0x3d2   : > { %4444 = vmatpush3.bf16.msra.mxu0 %v4760_v39  ;;  %v4382_v4 = vpop.f32.mrf.mxu0  ;;  %v4795_v39 = vld [vmem:[%s5754_s7 + $0x168] sm:$0xff]  }
 0x3d3   : > { %4445 = vmatprep.subr.bf16.mxu0 %v4871_v26  ;;  %v2720_v22 = vpack.c.bf16 %v4382_v4, %v4382_v4 }
 0x3d4   : > { %4406 = vmatpush3.bf16.msra.mxu1 %v4754_v41  ;;  %v2133_v7 = vpop.f32.mrf.mxu0  ;;  %v4797_v41 = vld [vmem:[%s5754_s7 + $0x160] sm:$0xff]  }
 0x3d5   : > { %4407 = vmatprep.subr.bf16.mxu1 %v4871_v26  ;;  %v2564_v10 = vpack.c.bf16 %v2133_v7, %v2133_v7  ;;  %v3448_v7 = vld [vmem:[%s5756_s9 + $0x38] sm:$0xff] }
 0x3d6   : > { %4446 = vmatpush3.bf16.msra.mxu0 %v4762_v42  ;;  %v4799_v42 = vld [vmem:[%s5754_s7 + $0x1b8] sm:$0xff]  }
 0x3d7   : > { %4463 = vmatprep.subr.bf16.mxu0 %v4871_v26 }
 0x3d8   : > { %4408 = vmatpush3.bf16.msra.mxu1 %v4755_v44  ;;  %v4801_v44 = vld [vmem:[%s5754_s7 + $0x1b0] sm:$0xff]  }
 0x3d9   : > { %4409 = vmatprep.subr.bf16.mxu1 %v4871_v26  ;;  %4448 = vmatmul.mubr.msk.bf16.vlgmr.msra.gmra.mxu0 %vm757_vm0, %v2486_v45  ;;  %v4803_v45 = vld [vmem:[%s5754_s7 + $0x1a8] sm:$0xff]  }
 0x3da   : > { %4464 = vmatpush3.bf16.msra.mxu0 %v4764_v46  ;;  %4471 = vmatprep.mubr.msk.bf16.mxu0 %vm4872_vm1, %v4871_v26  ;;  %v4390_v46 = vpop.f32.mrf.mxu1 }
 0x3db   : > { %4465 = vmatprep.subr.bf16.mxu0 %v4871_v26 }
 0x3dc   : > { %4410 = vmatpush3.bf16.msra.mxu1 %v4757_v47  ;;  %v4804_v47 = vld [vmem:[%s5754_s7 + $0x1a0] sm:$0xff]  }
 0x3dd   : > { %4427 = vmatprep.subr.bf16.mxu1 %v4871_v26 }
 0x3de   : > { %4466 = vmatpush3.bf16.msra.mxu0 %v4766_v48  ;;  %v2165_v48 = vpop.f32.mrf.mxu1 }
 0x3df   : > { %4412 = vmatmul.mubr.msk.bf16.vlgmr.msra.gmra.mxu1 %vm757_vm0, %v2177_v50  ;;  %4467 = vmatprep.subr.bf16.mxu0 %v4871_v26  ;;  %v3188_v50 = vpack.c.bf16 %v2165_v48, %v2165_v48 }
 0x3e0   : > { %4428 = vmatpush3.bf16.msra.mxu1 %v4759_v49  ;;  %4435 = vmatprep.mubr.msk.bf16.mxu1 %vm4872_vm1, %v4871_v26  ;;  %v4805_v49 = vld [vmem:[%s5754_s7 + $0x1f8] sm:$0xff]  }
 0x3e1   : > { %4429 = vmatprep.subr.bf16.mxu1 %v4871_v26 }
 0x3e2   : > { %4468 = vmatpush3.bf16.msra.mxu0 %v4768_v51  ;;  %v4806_v51 = vld [vmem:[%s5754_s7 + $0x1f0] sm:$0xff]  }
 0x3e3   : > { %4469 = vmatprep.subr.bf16.mxu0 %v4871_v26 }
 0x3e4   : > { %4430 = vmatpush3.bf16.msra.mxu1 %v4761_v52  ;;  %v4807_v52 = vld [vmem:[%s5754_s7 + $0x1e8] sm:$0xff]  }
 0x3e5   : > { %4431 = vmatprep.subr.bf16.mxu1 %v4871_v26 }
 0x3e6   : > { %4470 = vmatpush3.bf16.msra.mxu0 %v4770_v53  ;;  %v4808_v53 = vld [vmem:[%s5754_s7 + $0x1e0] sm:$0xff]  }
 0x3e7   : > { %4487 = vmatprep.subr.bf16.mxu0 %v4871_v26 }
 0x3e8   : > { %4432 = vmatpush3.bf16.msra.mxu1 %v4763_v54  ;;  %v3344_v54 = vpack.c.bf16 %v4390_v46, %v4390_v46 }
 0x3e9   : > { %4433 = vmatprep.subr.bf16.mxu1 %v4871_v26  ;;  %4472 = vmatmul.mubr.msk.bf16.vlgmr.msra.gmra.mxu0 %vm757_vm0, %v2642_v55  ;;  %v3456_v55 = vld [vmem:[%s5756_s9 + $0x78] sm:$0xff] }
 0x3ea   : > { %4488 = vmatpush3.bf16.msra.mxu0 %v4772_v56  ;;  %4495 = vmatprep.mubr.msk.bf16.mxu0 %vm4872_vm1, %v4871_v26  ;;  %v3455_v56 = vld [vmem:[%s5756_s9 + $0x70] sm:$0xff] }
 0x3eb   : > { %4489 = vmatprep.subr.bf16.mxu0 %v4871_v26 }
 0x3ec   : > { %4434 = vmatpush3.bf16.msra.mxu1 %v4765_v57  ;;  %v3454_v57 = vld [vmem:[%s5756_s9 + $0x68] sm:$0xff] }
 0x3ed   : > { %4451 = vmatprep.subr.bf16.mxu1 %v4871_v26 }
 0x3ee   : > { %4490 = vmatpush3.bf16.msra.mxu0 %v4774_v58 }
 0x3ef   : > { %4436 = vmatmul.mubr.msk.bf16.vlgmr.msra.gmra.mxu1 %vm757_vm0, %v2408_v60  ;;  %4491 = vmatprep.subr.bf16.mxu0 %v4871_v26 }
 0x3f0   : > { %4452 = vmatpush3.bf16.msra.mxu1 %v4767_v59  ;;  %4459 = vmatprep.mubr.msk.bf16.mxu1 %vm4872_vm1, %v4871_v26  ;;  %v3453_v59 = vld [vmem:[%s5756_s9 + $0x60] sm:$0xff] }
 0x3f1   : > { %4453 = vmatprep.subr.bf16.mxu1 %v4871_v26 }
 0x3f2   : > { %4492 = vmatpush3.bf16.msra.mxu0 %v4776_v61  ;;  %v3452_v61 = vld [vmem:[%s5756_s9 + $0x58] sm:$0xff] }
 0x3f3   : > { %4493 = vmatprep.subr.bf16.mxu0 %v4871_v26 }
 0x3f4   : > { %4454 = vmatpush3.bf16.msra.mxu1 %v4769_v63 }
 0x3f5   : > { %4455 = vmatprep.subr.bf16.mxu1 %v4871_v26 }
 0x3f6   : > { %4494 = vmatpush3.bf16.msra.mxu0 %v4778_v0 }
 0x3f7   : > { %4511 = vmatprep.subr.bf16.mxu0 %v4871_v26 }
 0x3f8   : > { %4456 = vmatpush3.bf16.msra.mxu1 %v4771_v2 }
 0x3f9   : > { %4457 = vmatprep.subr.bf16.mxu1 %v4871_v26  ;;  %4496 = vmatmul.mubr.msk.bf16.vlgmr.msra.gmra.mxu0 %vm757_vm0, %v2798_v3  ;;  %v3450_v3 = vld [vmem:[%s5756_s9 + $0x48] sm:$0xff] }
 0x3fa   : > { %4512 = vmatpush3.bf16.msra.mxu0 %v4780_v5  ;;  %4519 = vmatprep.mubr.msk.bf16.mxu0 %vm4872_vm1, %v4871_v26  ;;  %v3449_v5 = vld [vmem:[%s5756_s9 + $0x40] sm:$0xff] }
 0x3fb   : > { %4513 = vmatprep.subr.bf16.mxu0 %v4871_v26 }
 0x3fc   : > { %4458 = vmatpush3.bf16.msra.mxu1 %v4773_v6 }
 0x3fd   : > { %4475 = vmatprep.subr.bf16.mxu1 %v4871_v26 }
 0x3fe   : > { %4514 = vmatpush3.bf16.msra.mxu0 %v4782_v8  ;;  %v3447_v8 = vld [vmem:[%s5756_s9 + $0x30] sm:$0xff] }
 0x3ff   : > { %4460 = vmatmul.mubr.msk.bf16.vlgmr.msra.gmra.mxu1 %vm757_vm0, %v2564_v10  ;;  %4515 = vmatprep.subr.bf16.mxu0 %v4871_v26  ;;  %v3446_v10 = vld [vmem:[%s5756_s9 + $0x28] sm:$0xff] }
 0x400   : > { %4476 = vmatpush3.bf16.msra.mxu1 %v4775_v9  ;;  %4483 = vmatprep.mubr.msk.bf16.mxu1 %vm4872_vm1, %v4871_v26 }
 0x401   : > { %4477 = vmatprep.subr.bf16.mxu1 %v4871_v26 }
 0x402   : > { %4516 = vmatpush3.bf16.msra.mxu0 %v4784_v11 }
 0x403   : > { %4517 = vmatprep.subr.bf16.mxu0 %v4871_v26 }
 0x404   : > { %4478 = vmatpush3.bf16.msra.mxu1 %v4777_v12  ;;  %v3445_v12 = vld [vmem:[%s5756_s9 + $0x20] sm:$0xff] }
 0x405   : > { %4479 = vmatprep.subr.bf16.mxu1 %v4871_v26 }
 0x406   : > { %4518 = vmatpush3.bf16.msra.mxu0 %v4786_v13 }
 0x407   : > { %4535 = vmatprep.subr.bf16.mxu0 %v4871_v26 }
 0x408   : > { %4480 = vmatpush3.bf16.msra.mxu1 %v4779_v14  ;;  %v3444_v14 = vld [vmem:[%s5756_s9 + $0x18] sm:$0xff] }
 0x409   : > { %4481 = vmatprep.subr.bf16.mxu1 %v4871_v26  ;;  %4520 = vmatmul.mubr.msk.bf16.vlgmr.msra.gmra.mxu0 %vm757_vm0, %v2954_v15  ;;  %v3443_v15 = vld [vmem:[%s5756_s9 + $0x10] sm:$0xff] }
 0x40a   : > { %4536 = vmatpush3.bf16.msra.mxu0 %v4788_v16  ;;  %4543 = vmatprep.mubr.msk.bf16.mxu0 %vm4872_vm1, %v4871_v26 }
 0x40b   : > { %4537 = vmatprep.subr.bf16.mxu0 %v4871_v26 }
 0x40c   : > { %4482 = vmatpush3.bf16.msra.mxu1 %v4781_v17 }
 0x40d   : > { %4499 = vmatprep.subr.bf16.mxu1 %v4871_v26 }
 0x40e   : > { %4538 = vmatpush3.bf16.msra.mxu0 %v4790_v19 }
 0x40f   : > { %4484 = vmatmul.mubr.msk.bf16.vlgmr.msra.gmra.mxu1 %vm757_vm0, %v2720_v22  ;;  %4539 = vmatprep.subr.bf16.mxu0 %v4871_v26 }
 0x410   : > { %4500 = vmatpush3.bf16.msra.mxu1 %v4783_v20  ;;  %4507 = vmatprep.mubr.msk.bf16.mxu1 %vm4872_vm1, %v4871_v26 }
 0x411   : > { %4501 = vmatprep.subr.bf16.mxu1 %v4871_v26 }
 0x412   : > { %4540 = vmatpush3.bf16.msra.mxu0 %v4792_v23 }
 0x413   : > { %4541 = vmatprep.subr.bf16.mxu0 %v4871_v26 }
 0x414   : > { %4502 = vmatpush3.bf16.msra.mxu1 %v4785_v25 }
 0x415   : > { %4503 = vmatprep.subr.bf16.mxu1 %v4871_v26 }
 0x416   : > { %4542 = vmatpush3.bf16.msra.mxu0 %v4794_v27 }
 0x417   : > { %4559 = vmatprep.subr.bf16.mxu0 %v4871_v26 }
 0x418   : > { %4504 = vmatpush3.bf16.msra.mxu1 %v4787_v29 }
 0x419   : > { %4505 = vmatprep.subr.bf16.mxu1 %v4871_v26  ;;  %4544 = vmatmul.mubr.msk.bf16.vlgmr.msra.gmra.mxu0 %vm757_vm0, %v3110_v30 }
 0x41a   : > { %4560 = vmatpush3.bf16.msra.mxu0 %v4796_v31  ;;  %4567 = vmatprep.mubr.msk.bf16.mxu0 %vm4872_vm1, %v4871_v26 }
 0x41b   : > { %4561 = vmatprep.subr.bf16.mxu0 %v4871_v26 }
 0x41c   : > { %4506 = vmatpush3.bf16.msra.mxu1 %v4789_v32 }
 0x41d   : > { %4523 = vmatprep.subr.bf16.mxu1 %v4871_v26 }
 0x41e   : > { %4562 = vmatpush3.bf16.msra.mxu0 %v4798_v33 }
 0x41f   : > { %4508 = vmatmul.mubr.msk.bf16.vlgmr.msra.gmra.mxu1 %vm757_vm0, %v2876_v35  ;;  %4563 = vmatprep.subr.bf16.mxu0 %v4871_v26 }
 0x420   : > { %4524 = vmatpush3.bf16.msra.mxu1 %v4791_v34  ;;  %4531 = vmatprep.mubr.msk.bf16.mxu1 %vm4872_vm1, %v4871_v26 }
 0x421   : > { %4525 = vmatprep.subr.bf16.mxu1 %v4871_v26 }
 0x422   : > { %4564 = vmatpush3.bf16.msra.mxu0 %v4800_v36 }
 0x423   : > { %4565 = vmatprep.subr.bf16.mxu0 %v4871_v26 }
 0x424   : > { %4526 = vmatpush3.bf16.msra.mxu1 %v4793_v37 }
 0x425   : > { %4527 = vmatprep.subr.bf16.mxu1 %v4871_v26 }
 0x426   : > { %4566 = vmatpush3.bf16.msra.mxu0 %v4802_v38 }
 0x427   : > { %4583 = vmatprep.subr.mxu0 %v4871_v26 }
 0x428   : > { %4528 = vmatpush3.bf16.msra.mxu1 %v4795_v39 }
 0x429   : > { %4529 = vmatprep.subr.bf16.mxu1 %v4871_v26  ;;  %4568 = vmatmul.mubr.msk.bf16.vlgmr.msra.gmra.mxu0 %vm757_vm0, %v3266_v40 }
 0x42a   : > { %4615 = vmatprep.mubr.msk.f32.mxu0 %vm4872_vm1, %v4871_v26  ;;  %4584 = vmatpush3.msra.mxu0 %v3456_v55 }
 0x42b   : > { %4585 = vmatprep.subr.mxu0 %v4871_v26 }
 0x42c   : > { %4530 = vmatpush3.bf16.msra.mxu1 %v4797_v41  ;;  %4586 = vmatpush3.msra.mxu0 %v3455_v56 }
 0x42d   : > { %4547 = vmatprep.subr.bf16.mxu1 %v4871_v26  ;;  %4587 = vmatprep.subr.mxu0 %v4871_v26 }
 0x42e   : > { %4588 = vmatpush3.msra.mxu0 %v3454_v57 }
 0x42f   : > { %4532 = vmatmul.mubr.msk.bf16.vlgmr.msra.gmra.mxu1 %vm757_vm0, %v3032_v43  ;;  %4589 = vmatprep.subr.mxu0 %v4871_v26 }
 0x430   : > { %4548 = vmatpush3.bf16.msra.mxu1 %v4799_v42  ;;  %4555 = vmatprep.mubr.msk.bf16.mxu1 %vm4872_vm1, %v4871_v26 }
 0x431   : > { %4549 = vmatprep.subr.bf16.mxu1 %v4871_v26  ;;  %4590 = vmatpush3.msra.mxu0 %v3453_v59 }
 0x432   : > { %4591 = vmatprep.subr.mxu0 %v4871_v26 }
 0x433   : > { %4592 = vmatpush3.msra.mxu0 %v3452_v61 }
 0x434   : > { %4550 = vmatpush3.bf16.msra.mxu1 %v4801_v44  ;;  %4593 = vmatprep.subr.mxu0 %v4871_v26 }
 0x435   : > { %4551 = vmatprep.subr.bf16.mxu1 %v4871_v26  ;;  %4594 = vmatpush3.msra.mxu0 %v3451_v1 }
 0x436   : > { %4595 = vmatprep.subr.mxu0 %v4871_v26 }
 0x437   : > { %4596 = vmatpush3.msra.mxu0 %v3450_v3 }
 0x438   : > { %4552 = vmatpush3.bf16.msra.mxu1 %v4803_v45  ;;  %4597 = vmatprep.subr.mxu0 %v4871_v26 }
 0x439   : > { %4553 = vmatprep.subr.bf16.mxu1 %v4871_v26  ;;  %4598 = vmatpush3.msra.mxu0 %v3449_v5 }
 0x43a   : > { %4599 = vmatprep.subr.mxu0 %v4871_v26 }
 0x43b   : > { %4600 = vmatpush3.msra.mxu0 %v3448_v7 }
 0x43c   : > { %4554 = vmatpush3.bf16.msra.mxu1 %v4804_v47  ;;  %4601 = vmatprep.subr.mxu0 %v4871_v26 }
 0x43d   : > { %4571 = vmatprep.subr.bf16.mxu1 %v4871_v26  ;;  %4602 = vmatpush3.msra.mxu0 %v3447_v8 }
 0x43e   : > { %4603 = vmatprep.subr.mxu0 %v4871_v26 }
 0x43f   : > { %4556 = vmatmul.mubr.msk.bf16.vlgmr.msra.gmra.mxu1 %vm757_vm0, %v3188_v50  ;;  %4604 = vmatpush3.msra.mxu0 %v3446_v10 }
 0x440   : > { %4572 = vmatpush3.bf16.msra.mxu1 %v4805_v49  ;;  %4579 = vmatprep.mubr.msk.bf16.mxu1 %vm4872_vm1, %v4871_v26 }
 0x441   : > { %4573 = vmatprep.subr.bf16.mxu1 %v4871_v26  ;;  %4605 = vmatprep.subr.mxu0 %v4871_v26 }
 0x442   : > { %4606 = vmatpush3.msra.mxu0 %v3445_v12 }
 0x443   : > { %4607 = vmatprep.subr.mxu0 %v4871_v26 }
 0x444   : > { %4574 = vmatpush3.bf16.msra.mxu1 %v4806_v51  ;;  %4608 = vmatpush3.msra.mxu0 %v3444_v14 }
 0x445   : > { %4575 = vmatprep.subr.bf16.mxu1 %v4871_v26  ;;  %4609 = vmatprep.subr.mxu0 %v4871_v26 }
 0x446   : > { %4610 = vmatpush3.msra.mxu0 %v3443_v15 }
 0x447   : > { %4611 = vmatprep.subr.mxu0 %v4871_v26 }
 0x448   : > { %4576 = vmatpush3.bf16.msra.mxu1 %v4807_v52  ;;  %4612 = vmatpush3.msra.mxu0 %v3442_v18  ;;  %v3986_v18 = vld [vmem:[%s5755_s8] ss:$0 sm:$0xff] }
 0x449   : > { %4577 = vmatprep.subr.bf16.mxu1 %v4871_v26  ;;  %4613 = vmatprep.subr.mxu0 %v4871_v26 }
 0x44a   : > { %4614 = vmatpush3.msra.mxu0 %v3441_v21 }
 0x44c   : > { %4578 = vmatpush3.bf16.msra.mxu1 %v4808_v53 }
 0x44f   : > { %4580 = vmatmul.mubr.msk.bf16.vlgmr.msra.gmra.mxu1 %vm757_vm0, %v3344_v54 }
 0x489   : > { %v2401_v58 = vpop.f32.mrf.mxu0 }
 0x48b   : > { %v4425_v60 = vpop.f32.mrf.mxu0 }
 0x48d   : > { %v2404_v62 = vpop.f32.mrf.mxu0 }
 0x48f   : > { %v2257_v63 = vpop.f32.mrf.mxu1  ;;  %v4426_v0 = vpop.f32.mrf.mxu0 }
 0x491   : > { %v4401_v2 = vpop.f32.mrf.mxu1 }
 0x493   : > { %v2260_v4 = vpop.f32.mrf.mxu1 }
 0x495   : > { %v4402_v6 = vpop.f32.mrf.mxu1 }
 0x499   : > { %v2557_v9 = vpop.f32.mrf.mxu0 }
 0x49b   : > { %v4449_v11 = vpop.f32.mrf.mxu0 }
 0x49d   : > { %v2560_v13 = vpop.f32.mrf.mxu0 }
 0x49f   : > { %v2324_v16 = vpop.f32.mrf.mxu1  ;;  %v4450_v17 = vpop.f32.mrf.mxu0 }
 0x4a0   : > { %v2325_v19 = vadd.f32 %v2324_v16, %v2257_v63 }
 0x4a1   : > { %v4413_v20 = vpop.f32.mrf.mxu1 }
 0x4a2   : > { %v2407_v22 = vadd.f32 %v2401_v58, %v2325_v19 }
 0x4a3   : > { %v2327_v23 = vpop.f32.mrf.mxu1 }
 0x4a5   : > { %v4414_v24 = vpop.f32.mrf.mxu1 }
 0x4a9   : > { %v2713_v25 = vpop.f32.mrf.mxu0 }
 0x4ab   : > { %v4473_v27 = vpop.f32.mrf.mxu0 }
 0x4ad   : > { %v2716_v28 = vpop.f32.mrf.mxu0 }
 0x4af   : > { %v2479_v29 = vpop.f32.mrf.mxu1  ;;  %v4474_v30 = vpop.f32.mrf.mxu0 }
 0x4b0   : > { %v2485_v31 = vadd.f32 %v2479_v29, %v2407_v22 }
 0x4b1   : > { %v4437_v32 = vpop.f32.mrf.mxu1 }
 0x4b2   : > { %v2563_v33 = vadd.f32 %v2557_v9, %v2485_v31 }
 0x4b3   : > { %v2482_v34 = vpop.f32.mrf.mxu1 }
 0x4b4   : > { %v3457_v34 = vld [vmem:[%s5757_s10] sm:$0x1] }
 0x4b5   : > { %v4438_v35 = vpop.f32.mrf.mxu1 }
 0x4b9   : > { %v2869_v36 = vpop.f32.mrf.mxu0 }
 0x4bb   : > { %v4497_v37 = vpop.f32.mrf.mxu0 }
 0x4bd   : > { %v2872_v38 = vpop.f32.mrf.mxu0 }
 0x4bf   : > { %v2635_v39 = vpop.f32.mrf.mxu1  ;;  %v4498_v40 = vpop.f32.mrf.mxu0 }
 0x4c0   : > { %v2641_v41 = vadd.f32 %v2635_v39, %v2563_v33 }
 0x4c1   : > { %v4461_v42 = vpop.f32.mrf.mxu1 }
 0x4c2   : > { %v2719_v26 = vadd.f32 %v2713_v25, %v2641_v41 }
 0x4c3   : > { %v2638_v43 = vpop.f32.mrf.mxu1 }
 0x4c5   : > { %v4462_v44 = vpop.f32.mrf.mxu1 }
 0x4c9   : > { %v3025_v45 = vpop.f32.mrf.mxu0 }
 0x4cb   : > { %v4521_v46 = vpop.f32.mrf.mxu0 }
 0x4cd   : > { %v3028_v47 = vpop.f32.mrf.mxu0 }
 0x4cf   : > { %v2791_v48 = vpop.f32.mrf.mxu1  ;;  %v4522_v49 = vpop.f32.mrf.mxu0 }
 0x4d0   : > { %v2797_v50 = vadd.f32 %v2791_v48, %v2719_v26 }
 0x4d1   : > { %v4485_v51 = vpop.f32.mrf.mxu1 }
 0x4d2   : > { %v2875_v52 = vadd.f32 %v2869_v36, %v2797_v50 }
 0x4d3   : > { %v2794_v53 = vpop.f32.mrf.mxu1 }
 0x4d5   : > { %v4486_v54 = vpop.f32.mrf.mxu1 }
 0x4d9   : > { %v3181_v55 = vpop.f32.mrf.mxu0 }
 0x4db   : > { %v4545_v56 = vpop.f32.mrf.mxu0 }
 0x4dd   : > { %v3184_v57 = vpop.f32.mrf.mxu0 }
 0x4df   : > { %v2947_v58 = vpop.f32.mrf.mxu1  ;;  %v4546_v59 = vpop.f32.mrf.mxu0 }
 0x4e0   : > { %v2953_v7 = vadd.f32 %v2947_v58, %v2875_v52 }
 0x4e1   : > { %v4509_v60 = vpop.f32.mrf.mxu1 }
 0x4e2   : > { %v3031_v10 = vadd.f32 %v3025_v45, %v2953_v7 }
 0x4e3   : > { %v2950_v61 = vpop.f32.mrf.mxu1 }
 0x4e5   : > { %v4510_v62 = vpop.f32.mrf.mxu1 }
 0x4e9   : > { %v3337_v63 = vpop.f32.mrf.mxu0 }
 0x4eb   : > { %v4569_v0 = vpop.f32.mrf.mxu0 }
 0x4ed   : > { %v3340_v1 = vpop.f32.mrf.mxu0 }
 0x4ef   : > { %v3103_v2 = vpop.f32.mrf.mxu1  ;;  %v4570_v3 = vpop.f32.mrf.mxu0 }
 0x4f0   : > { %v3109_v12 = vadd.f32 %v3103_v2, %v3031_v10 }
 0x4f1   : > { %v4533_v4 = vpop.f32.mrf.mxu1 }
 0x4f2   : > { %v3187_v14 = vadd.f32 %v3181_v55, %v3109_v12 }
 0x4f3   : > { %v3106_v5 = vpop.f32.mrf.mxu1 }
 0x4f5   : > { %v4534_v6 = vpop.f32.mrf.mxu1 }
 0x4ff   : > { %v3259_v8 = vpop.f32.mrf.mxu1 }
 0x500   : > { %v3265_v15 = vadd.f32 %v3259_v8, %v3187_v14 }
 0x501   : > { %v4557_v9 = vpop.f32.mrf.mxu1 }
 0x502   : > { %v3343_v16 = vadd.f32 %v3337_v63, %v3265_v15 }
 0x503   : > { %v3262_v11 = vpop.f32.mrf.mxu1 }
 0x505   : > { %v4558_v13 = vpop.f32.mrf.mxu1 }
 0x50f   : > { %v3415_v17 = vpop.f32.mrf.mxu1 }
 0x510   : > { %v3421_v19 = vadd.f32 %v3415_v17, %v3343_v16 }
 0x511   : > { %v4581_v20 = vpop.f32.mrf.mxu1 }
 0x512   : > { %v3429_v21 = vadd.f32 %v3986_v18, %v3421_v19 }
 0x513   : > { %v3418_v22 = vpop.f32.mrf.mxu1 }
 0x514   : > { %v3430_v23 = vmax.f32 %v3429_v21, 0.0 }
 0x515   : > { %v4582_v24 = vpop.f32.mrf.mxu1 }
 0x516   : > { %v3432_v25 = vsel %vm3431_vm4, %v3430_v23, 0.0 }
 0x517   : > { %v3433_v27 = vrot.slane %v3432_v25, 4 }
 0x519   : > { %v3434_v28 = vadd.f32 %v3433_v27, %v3432_v25 }
 0x51b   : > { %v3435_v29 = vrot.slane %v3434_v28, 2 }
 0x51d   : > { %v3436_v30 = vadd.f32 %v3435_v29, %v3434_v28 }
 0x51f   : > { %v3437_v31 = vrot.slane %v3436_v30, 1 }
 0x521   : > { %v3438_v32 = vadd.f32 %v3437_v31, %v3436_v30 }
 0x523   : > { %v3440_v33 = vmul.f32 0.25, %v3438_v32 }
 0x525   : > { %4616 = vmatmul.mubr.f32.vlgmr.msra.gmra.mxu0 %v3440_v33 }
 0x5e5   : > { %v3524_v35 = vpop.f32.mrf.mxu0 }
 0x5e6   : > { %v3525_v36 = vadd.f32 %v3524_v35, %v3457_v34 }
 0x5e7   : > { %v4617_v37 = vpop.f32.mrf.mxu0 }
 0x5e8   : > { %3529 = vst.msk [vmem:[%s378_s13] sm:$0x1] %vm3528_vm5, %v3525_v36 }
 0x5e9   : > { %4822 = shalt.err (!%p4819_p3)
}
 0x5ea   : > { %s4823_s30 = scalar_lea.hbm %s5712_s16, 16  ;;  %s4827_s15 = scalar_lea.hbm %s5758_s11, 32 }
 0x5eb   : > { %p4824_p4 = scmp.ne.s32.totalorder %s5712_s16, %s4823_s30  ;;  %p4828_p9 = scmp.lt.s32.totalorder %s5712_s16, %s5758_s11 }
 0x5ec   : > { %p4829_p10 = scmp.lt.s32.totalorder %s4827_s15, %s4823_s30 }
 0x5ed   : > { %p4825_p7 = pnand %p4824_p4, %p4972_p5 }
 0x5ee   : > { %p4830_p11 = por %p4829_p10, %p4828_p9 }
 0x5ef   : > { %p4826_p8 = pneg %p4825_p7 }
 0x5f1   : > { %p4831_p12 = pnand %p4830_p11, %p4826_p8 }
 0x5f3   : > { %4834 = shalt.err (!%p4831_p12)
}
 0x5f4   : > { %4620 = dma.vmem_to_hbm [thread:$0]  (%p4972_p5), %s3544_s14, 16, %s5712_s16, %s3531_s24  }
 0x5f5 PF: > { %p4626_p13 = scmp.ge.s32.totalorder %s4869_s20, 2  ;;  %s3555_s26 = sand.u32 1, %s4857_s17  }
 0x5f6   : > { %s3556_s25 = scalar_lea.sflag [#allocation3], %s3555_s26 }
 0x5f7   : > { %p4623_p0 = pnand %p4626_p13, %p4976_p6 }
 0x5f9   : > { %p4624_p1 = pneg %p4623_p0 }
 0x5fb   : > { %4852 = dma.done.wait (%p4624_p1), %s3556_s25, 16  }
 0x5fc   : > { %4854 = vsyncadd (%p4624_p1), %s3556_s25, 4294967280  ;;  %s5762_s29 = sld [smem:[#allocation5_spill]]  ;;  %p21_p2 = scmp.ge.s32.totalorder %s4959_s23, 4  }
 0x5fd   : > { %s5763_s17 = smov %s4861_s18  ;;  %s5764_s18 = smov %s4865_s19 }
 0x5fe   : > { %s5766_s20 = smov %s4959_s23  ;;  %23 = sbr.rel (!%p21_p2) target bundleno = 3 (0x3), region = 129 }
 0x602   : > { %s5765_s19 = smov %s5762_s29 }
 0x603   :  { %3560 = vsyncpa [#allocation3], 1 }
 0x604   :  { %3562 = vsyncpa [#allocation3 + $0x1], 1 }

</bundles_post_ra>
